<compile_context>
chip_gen: v5e
topology: v5e:2x2
jax: 0.10.0
libtpu: 0.0.40
codegen_flags: <defaults>
</compile_context>

<pallas_src>
import functools

import jax
import jax.numpy as jnp
from jax import lax
from jax.experimental import pallas as pl
from jax.experimental.pallas import tpu as pltpu

VMEM = pltpu.MemorySpace.VMEM
BF16 = jnp.bfloat16
F32 = jnp.float32


class Config:
    text_vocab_size = 128
    audio_vocab_size = 64
    audio_num_codebooks = 4
    embed_dim = 128          # backbone_dim
    num_heads = 4
    num_kv_heads = 1
    head_dim = 32
    intermediate_dim = 256
    num_layers = 2
    norm_eps = 1e-6
    rope_theta = 10000.0


# ----------------------- kernel 1: masked codebook sum -----------------------

def _embed_sum_kernel(e_ref, m_ref, o_ref):
    # e: (N, K+1, D) f32, m: (N, K+1, 1) f32 -> (N, D) bf16
    o_ref[...] = jnp.sum(e_ref[...] * m_ref[...], axis=1).astype(o_ref.dtype)


def masked_embed_sum(embeds, mask):
    n, _, d = embeds.shape
    return pl.pallas_call(
        _embed_sum_kernel,
        out_shape=jax.ShapeDtypeStruct((n, d), BF16),
        in_specs=[pl.BlockSpec(memory_space=VMEM)] * 2,
        out_specs=pl.BlockSpec(memory_space=VMEM),
    )(embeds, mask)


# --------------------- kernel 2: fused transformer layer ---------------------

def _make_layer_kernel(cfg):
    nh, nkv, hd = cfg.num_heads, cfg.num_kv_heads, cfg.head_dim
    dq, dkv = nh * hd, nkv * hd
    half = hd // 2
    inter = cfg.intermediate_dim
    eps = cfg.norm_eps
    scale = 1.0 / (hd ** 0.5)
    group = nh // nkv

    def rms(x, w):
        var = jnp.mean(x * x, axis=-1, keepdims=True)
        return x * lax.rsqrt(var + eps) * (1.0 + w)     # Gemma-style (1 + w)

    def kernel(h_ref, pc_ref, pr_ref, cos_ref, sin_ref,
               saw_ref, wqkv_ref, wo_ref, mlw_ref, wgu_ref, wd_ref, o_ref):
        x = h_ref[0].astype(F32)                        # (S, D) residual stream

        # ---- attention block: norm + fused QKV + RoPE + GQA attn + proj + residual
        xn = rms(x, saw_ref[...])
        qkv = jnp.dot(xn.astype(BF16), wqkv_ref[...],
                      preferred_element_type=F32)       # (S, dq + 2*dkv)
        q = qkv[:, :dq]
        k = qkv[:, dq:dq + dkv]
        v = qkv[:, dq + dkv:dq + 2 * dkv]

        cos = cos_ref[0]                                # (S, hd//2)
        sin = sin_ref[0]
        # causal mask generated in-kernel from positions (no (B*H,S,S) in HBM)
        mask = pc_ref[0] >= pr_ref[0]                   # (S,1)>=(1,S) -> (S,S)

        def rope(t):                                    # half-split rotation
            t1 = t[:, :half]
            t2 = t[:, half:]
            return jnp.concatenate([t1 * cos - t2 * sin,
                                    t1 * sin + t2 * cos], axis=-1)

        outs = []
        for h_i in range(nh):                           # static head loop (GQA in-kernel)
            q_h = rope(q[:, h_i * hd:(h_i + 1) * hd]) * scale   # scale folded into q
            g_i = h_i // group
            k_h = rope(k[:, g_i * hd:(g_i + 1) * hd])
            v_h = v[:, g_i * hd:(g_i + 1) * hd]
            s = lax.dot_general(q_h.astype(BF16), k_h.astype(BF16),
                                (((1,), (1,)), ((), ())),
                                preferred_element_type=F32)     # (S, S) fp32 scores
            s = jnp.where(mask, s, -1e30)
            m = jnp.max(s, axis=-1, keepdims=True)
            p = jnp.exp(s - m)
            l = jnp.sum(p, axis=-1, keepdims=True)
            p = p * pl.reciprocal(l, approx=True)               # EUP reciprocal
            outs.append(jnp.dot(p.astype(BF16), v_h.astype(BF16),
                                preferred_element_type=F32))    # (S, hd)
        attn = jnp.concatenate(outs, axis=-1)                   # (S, nh*hd)
        h1 = x + jnp.dot(attn.astype(BF16), wo_ref[...],
                         preferred_element_type=F32)            # fused residual

        # ---- MLP block: norm + fused gate/up + GeGLU + down proj + residual
        xn2 = rms(h1, mlw_ref[...])
        gu = jnp.dot(xn2.astype(BF16), wgu_ref[...],
                     preferred_element_type=F32)                # (S, 2*inter)
        gate = gu[:, :inter]
        up = gu[:, inter:]
        act = jax.nn.gelu(gate, approximate=True) * up
        h2 = h1 + jnp.dot(act.astype(BF16), wd_ref[...],
                          preferred_element_type=F32)           # fused residual

        o_ref[0] = h2.astype(o_ref.dtype)                       # bf16, lane-dense D

    return kernel


def make_layer_fn(cfg, b, s):
    d = cfg.embed_dim
    half = cfg.head_dim // 2
    kernel = _make_layer_kernel(cfg)
    full = pl.BlockSpec(memory_space=VMEM)                      # whole-array weights
    return pl.pallas_call(
        kernel,
        out_shape=jax.ShapeDtypeStruct((b, s, d), BF16),
        grid=(b,),
        in_specs=[
            pl.BlockSpec((1, s, d), lambda i: (i, 0, 0)),       # h (aliased to output)
            pl.BlockSpec((1, s, 1), lambda i: (i, 0, 0)),       # positions (column)
            pl.BlockSpec((1, 1, s), lambda i: (i, 0, 0)),       # positions (row)
            pl.BlockSpec((1, s, half), lambda i: (i, 0, 0)),    # cos
            pl.BlockSpec((1, s, half), lambda i: (i, 0, 0)),    # sin
            full, full, full, full, full, full,                 # layer weights
        ],
        out_specs=pl.BlockSpec((1, s, d), lambda i: (i, 0, 0)),
        input_output_aliases={0: 0},                            # update h in place
        compiler_params=pltpu.CompilerParams(
            dimension_semantics=("parallel",)),
    )


# ---------------- kernel 3: final RMSNorm + codebook0 head (fused) ----------------

def _make_head_kernel(eps):
    def kernel(h_ref, nw_ref, w_ref, o_ref):
        x = h_ref[...][:, -1, :].astype(F32)                    # last position, (B, D)
        var = jnp.mean(x * x, axis=-1, keepdims=True)
        xn = x * lax.rsqrt(var + eps) * (1.0 + nw_ref[...])
        o_ref[...] = jnp.dot(xn.astype(BF16), w_ref[...],
                             preferred_element_type=F32)        # (B, audio_vocab)
    return kernel


def final_norm_head(h, norm_w, head_w, eps):
    b = h.shape[0]
    v = head_w.shape[1]
    return pl.pallas_call(
        _make_head_kernel(eps),
        out_shape=jax.ShapeDtypeStruct((b, v), F32),
        in_specs=[pl.BlockSpec(memory_space=VMEM)] * 3,
        out_specs=pl.BlockSpec(memory_space=VMEM),
    )(h, norm_w, head_w)


# --------------------------------- parameters ---------------------------------

def init_params(key, cfg):
    d = cfg.embed_dim
    keys = jax.random.split(key, 3 + cfg.num_layers)

    def w(k_, shape, scale=0.02):
        return scale * jax.random.normal(k_, shape, dtype=F32)

    params = {
        'text_emb': w(keys[0], (cfg.text_vocab_size, d)),
        'audio_emb': w(keys[1], (cfg.audio_vocab_size * cfg.audio_num_codebooks, d)),
        'c0_head': w(keys[2], (d, cfg.audio_vocab_size)).astype(BF16),
        'final_norm': jnp.zeros((1, d), F32),
        'layers': [],
    }
    for i in range(cfg.num_layers):
        lk = jax.random.split(keys[3 + i], 7)
        wq = w(lk[0], (d, cfg.num_heads * cfg.head_dim))
        wk = w(lk[1], (d, cfg.num_kv_heads * cfg.head_dim))
        wv = w(lk[2], (d, cfg.num_kv_heads * cfg.head_dim))
        wg = w(lk[4], (d, cfg.intermediate_dim))
        wu = w(lk[5], (d, cfg.intermediate_dim))
        params['layers'].append({
            'sa_norm': jnp.zeros((1, d), F32),
            'w_qkv': jnp.concatenate([wq, wk, wv], axis=1).astype(BF16),  # fused QKV
            'wo': w(lk[3], (cfg.num_heads * cfg.head_dim, d)).astype(BF16),
            'mlp_norm': jnp.zeros((1, d), F32),
            'w_gu': jnp.concatenate([wg, wu], axis=1).astype(BF16),       # fused gate/up
            'wd': w(lk[6], (cfg.intermediate_dim, d)).astype(BF16),
        })
    return params


# ----------------------------------- forward -----------------------------------

def forward(params, cfg, tokens, tokens_mask, input_pos):
    """Equivalent of Model.forward: returns codebook-0 logits (B, audio_vocab)."""
    b, s, k1 = tokens.shape
    k = cfg.audio_num_codebooks
    d = cfg.embed_dim

    # ---- _embed_tokens (gathers stay in XLA glue) ----
    text_tok = tokens[:, :, -1]
    text_embeds = jnp.take(params['text_emb'], text_tok, axis=0)[:, :, None, :]
    audio_tok = tokens[:, :, :k] + cfg.audio_vocab_size * jnp.arange(k, dtype=tokens.dtype)
    audio_embeds = jnp.take(params['audio_emb'], audio_tok.reshape(-1),
                            axis=0).reshape(b, s, k, d)
    embeds = jnp.concatenate([audio_embeds, text_embeds], axis=2)       # (B,S,K+1,D)
    mask_f = tokens_mask.astype(F32)[..., None]

    # ---- masked sum over codebooks (Pallas, outputs bf16 residual stream) ----
    h = masked_embed_sum(embeds.reshape(b * s, k1, d),
                         mask_f.reshape(b * s, k1, 1)).reshape(b, s, d)

    # ---- RoPE tables & position operands shared by every layer ----
    half = cfg.head_dim // 2
    freqs = 1.0 / (cfg.rope_theta ** (jnp.arange(half, dtype=F32) / half))
    ang = input_pos.astype(F32)[..., None] * freqs                      # (B, S, half)
    cos = jnp.cos(ang)
    sin = jnp.sin(ang)
    pos_col = input_pos[:, :, None].astype(jnp.int32)                   # (B, S, 1)
    pos_row = input_pos[:, None, :].astype(jnp.int32)                   # (B, 1, S)

    # ---- fused Gemma-style backbone: one pallas_call per layer ----
    layer_fn = make_layer_fn(cfg, b, s)
    for lyr in params['layers']:
        h = layer_fn(h, pos_col, pos_row, cos, sin,
                     lyr['sa_norm'], lyr['w_qkv'], lyr['wo'],
                     lyr['mlp_norm'], lyr['w_gu'], lyr['wd'])

    # ---- fused final norm + codebook0 head on the last position ----
    return final_norm_head(h, params['final_norm'], params['c0_head'], cfg.norm_eps)


if __name__ == "__main__":
    cfg = Config()
    key = jax.random.PRNGKey(0)
    pkey, tkey, mkey = jax.random.split(key, 3)
    params = init_params(pkey, cfg)

    B, S = 2, 8
    K1 = cfg.audio_num_codebooks + 1
    tokens = jax.random.randint(tkey, (B, S, K1), 0, cfg.audio_vocab_size,
                                dtype=jnp.int32)
    tokens_mask = jax.random.bernoulli(mkey, 0.9, (B, S, K1))
    input_pos = jnp.broadcast_to(jnp.arange(S, dtype=jnp.int32), (B, S))

    fwd = jax.jit(lambda p, t, m, ip: forward(p, cfg, t, m, ip))
    logits = fwd(params, tokens, tokens_mask, input_pos)
    logits = jax.block_until_ready(logits)
    assert logits.shape == (B, cfg.audio_vocab_size)
    assert bool(jnp.all(jnp.isfinite(logits)))
    print("KERNEL_OK")
</pallas_src>

<mosaic_0001>
module attributes {stable_mosaic.version = 11 : i64} {
  func.func @_embed_sum_kernel(%arg0: memref<16x5x128xf32, #tpu.memory_space<vmem>>, %arg1: memref<16x5x1xf32, #tpu.memory_space<vmem>>, %arg2: memref<16x128xbf16, #tpu.memory_space<vmem>>) attributes {dimension_semantics = [], scalar_prefetch = 0 : i64, scratch_operands = 0 : i64, tpu.core_type = #tpu.core_type<tc>} {
    %c0 = arith.constant 0 : index
    %c0_0 = arith.constant 0 : index
    %c0_1 = arith.constant 0 : index
    %0 = vector.load %arg0[%c0, %c0_0, %c0_1] : memref<16x5x128xf32, #tpu.memory_space<vmem>>, vector<16x5x128xf32>
    %c0_2 = arith.constant 0 : index
    %c0_3 = arith.constant 0 : index
    %c0_4 = arith.constant 0 : index
    %1 = vector.load %arg1[%c0_2, %c0_3, %c0_4] : memref<16x5x1xf32, #tpu.memory_space<vmem>>, vector<16x5x1xf32>
    %2 = vector.broadcast %1 : vector<16x5x1xf32> to vector<16x5x128xf32>
    %3 = arith.mulf %0, %2 : vector<16x5x128xf32>
    %cst = arith.constant dense<0.000000e+00> : vector<16x128xf32>
    %4 = vector.multi_reduction <add>, %3, %cst [1] : vector<16x5x128xf32> to vector<16x128xf32>
    %5 = arith.truncf %4 : vector<16x128xf32> to vector<16x128xbf16>
    %c0_5 = arith.constant 0 : index
    %c0_6 = arith.constant 0 : index
    %6 = vector.load %arg2[%c0_5, %c0_6] : memref<16x128xbf16, #tpu.memory_space<vmem>>, vector<16x128xbf16>
    tpu.vector_store %arg2[%c0_5, %c0_6], %5 {strides = array<i32>} : memref<16x128xbf16, #tpu.memory_space<vmem>>, vector<16x128xbf16>,
    return
  }
}

module attributes {stable_mosaic.version = 11 : i64} {
  func.func @kernel(%arg0: i32, %arg1: memref<1x8x128xbf16, #tpu.memory_space<vmem>>, %arg2: memref<1x8x1xi32, #tpu.memory_space<vmem>>, %arg3: memref<1x1x8xi32, #tpu.memory_space<vmem>>, %arg4: memref<1x8x16xf32, #tpu.memory_space<vmem>>, %arg5: memref<1x8x16xf32, #tpu.memory_space<vmem>>, %arg6: memref<1x128xf32, #tpu.memory_space<vmem>>, %arg7: memref<128x192xbf16, #tpu.memory_space<vmem>>, %arg8: memref<128x128xbf16, #tpu.memory_space<vmem>>, %arg9: memref<1x128xf32, #tpu.memory_space<vmem>>, %arg10: memref<128x512xbf16, #tpu.memory_space<vmem>>, %arg11: memref<256x128xbf16, #tpu.memory_space<vmem>>, %arg12: memref<1x8x128xbf16, #tpu.memory_space<vmem>>) attributes {dimension_semantics = [#tpu.dimension_semantics<parallel>], iteration_bounds = array<i64: 2>, scalar_prefetch = 0 : i64, scratch_operands = 0 : i64, tpu.core_type = #tpu.core_type<tc>, window_params = [{transform_indices = @transform_0, window_bounds = array<i64: 1, 8, 128>}, {transform_indices = @transform_1, window_bounds = array<i64: 1, 8, 1>}, {transform_indices = @transform_2, window_bounds = array<i64: 1, 1, 8>}, {transform_indices = @transform_3, window_bounds = array<i64: 1, 8, 16>}, {transform_indices = @transform_4, window_bounds = array<i64: 1, 8, 16>}, {pipeline_mode = #tpu.pipeline_mode<synchronous>, transform_indices = @transform_5, window_bounds = array<i64: 1, 128>}, {pipeline_mode = #tpu.pipeline_mode<synchronous>, transform_indices = @transform_6, window_bounds = array<i64: 128, 192>}, {pipeline_mode = #tpu.pipeline_mode<synchronous>, transform_indices = @transform_7, window_bounds = array<i64: 128, 128>}, {pipeline_mode = #tpu.pipeline_mode<synchronous>, transform_indices = @transform_8, window_bounds = array<i64: 1, 128>}, {pipeline_mode = #tpu.pipeline_mode<synchronous>, transform_indices = @transform_9, window_bounds = array<i64: 128, 512>}, {pipeline_mode = #tpu.pipeline_mode<synchronous>, transform_indices = @transform_10, window_bounds = array<i64: 256, 128>}, {transform_indices = @transform_11, window_bounds = array<i64: 1, 8, 128>}]} {
    %c0 = arith.constant 0 : index
    %c0_0 = arith.constant 0 : index
    %c0_1 = arith.constant 0 : index
    %0 = vector.load %arg1[%c0, %c0_0, %c0_1] : memref<1x8x128xbf16, #tpu.memory_space<vmem>>, vector<1x8x128xbf16>
    %1 = vector.shape_cast %0 : vector<1x8x128xbf16> to vector<8x128xbf16>
    %2 = arith.extf %1 : vector<8x128xbf16> to vector<8x128xf32>
    %c0_2 = arith.constant 0 : index
    %c0_3 = arith.constant 0 : index
    %3 = vector.load %arg6[%c0_2, %c0_3] : memref<1x128xf32, #tpu.memory_space<vmem>>, vector<1x128xf32>
    %4 = arith.mulf %2, %2 : vector<8x128xf32>
    %cst = arith.constant dense<0.000000e+00> : vector<8xf32>
    %5 = vector.multi_reduction <add>, %4, %cst [1] : vector<8x128xf32> to vector<8xf32>
    %6 = vector.shape_cast %5 : vector<8xf32> to vector<8x1xf32>
    %cst_4 = arith.constant 1.280000e+02 : f32
    %7 = vector.broadcast %cst_4 : f32 to vector<8x1xf32>
    %8 = arith.divf %6, %7 : vector<8x1xf32>
    %cst_5 = arith.constant 9.99999997E-7 : f32
    %9 = vector.broadcast %cst_5 : f32 to vector<8x1xf32>
    %10 = arith.addf %8, %9 : vector<8x1xf32>
    %11 = math.rsqrt %10 : vector<8x1xf32>
    %12 = vector.broadcast %11 : vector<8x1xf32> to vector<8x128xf32>
    %13 = arith.mulf %2, %12 : vector<8x128xf32>
    %cst_6 = arith.constant 1.000000e+00 : f32
    %14 = vector.broadcast %cst_6 : f32 to vector<1x128xf32>
    %15 = arith.addf %14, %3 : vector<1x128xf32>
    %16 = vector.broadcast %15 : vector<1x128xf32> to vector<8x128xf32>
    %17 = arith.mulf %13, %16 : vector<8x128xf32>
    %18 = arith.truncf %17 : vector<8x128xf32> to vector<8x128xbf16>
    %c0_7 = arith.constant 0 : index
    %c0_8 = arith.constant 0 : index
    %19 = vector.load %arg7[%c0_7, %c0_8] : memref<128x192xbf16, #tpu.memory_space<vmem>>, vector<128x192xbf16>
    %cst_9 = arith.constant dense<0.000000e+00> : vector<8x192xf32>
    %20 = tpu.matmul %18, %19, %cst_9 {dimension_numbers = #tpu.dot_dimension_numbers<[1], [0], [0], [1], [0, 0, 1, 1], [], []>} : vector<8x128xbf16>, vector<128x192xbf16>, vector<8x192xf32> -> vector<8x192xf32>
    %21 = vector.extract_strided_slice %20 {offsets = [0, 0], sizes = [8, 128], strides = [1, 1]} : vector<8x192xf32> to vector<8x128xf32>
    %22 = vector.extract_strided_slice %20 {offsets = [0, 128], sizes = [8, 32], strides = [1, 1]} : vector<8x192xf32> to vector<8x32xf32>
    %23 = vector.extract_strided_slice %20 {offsets = [0, 160], sizes = [8, 32], strides = [1, 1]} : vector<8x192xf32> to vector<8x32xf32>
    %c0_10 = arith.constant 0 : index
    %c0_11 = arith.constant 0 : index
    %c0_12 = arith.constant 0 : index
    %24 = vector.load %arg4[%c0_10, %c0_11, %c0_12] : memref<1x8x16xf32, #tpu.memory_space<vmem>>, vector<1x8x16xf32>
    %25 = vector.shape_cast %24 : vector<1x8x16xf32> to vector<8x16xf32>
    %c0_13 = arith.constant 0 : index
    %c0_14 = arith.constant 0 : index
    %c0_15 = arith.constant 0 : index
    %26 = vector.load %arg5[%c0_13, %c0_14, %c0_15] : memref<1x8x16xf32, #tpu.memory_space<vmem>>, vector<1x8x16xf32>
    %27 = vector.shape_cast %26 : vector<1x8x16xf32> to vector<8x16xf32>
    %c0_16 = arith.constant 0 : index
    %c0_17 = arith.constant 0 : index
    %c0_18 = arith.constant 0 : index
    %28 = vector.load %arg2[%c0_16, %c0_17, %c0_18] : memref<1x8x1xi32, #tpu.memory_space<vmem>>, vector<1x8x1xi32>
    %29 = vector.shape_cast %28 : vector<1x8x1xi32> to vector<8x1xi32>
    %c0_19 = arith.constant 0 : index
    %c0_20 = arith.constant 0 : index
    %c0_21 = arith.constant 0 : index
    %30 = vector.load %arg3[%c0_19, %c0_20, %c0_21] : memref<1x1x8xi32, #tpu.memory_space<vmem>>, vector<1x1x8xi32>
    %31 = vector.shape_cast %30 : vector<1x1x8xi32> to vector<1x8xi32>
    %32 = vector.broadcast %29 : vector<8x1xi32> to vector<8x8xi32>
    %33 = vector.broadcast %31 : vector<1x8xi32> to vector<8x8xi32>
    %34 = arith.cmpi sge, %32, %33 : vector<8x8xi32>
    %35 = vector.extract_strided_slice %21 {offsets = [0, 0], sizes = [8, 32], strides = [1, 1]} : vector<8x128xf32> to vector<8x32xf32>
    %36 = vector.extract_strided_slice %35 {offsets = [0, 0], sizes = [8, 16], strides = [1, 1]} : vector<8x32xf32> to vector<8x16xf32>
    %37 = vector.extract_strided_slice %35 {offsets = [0, 16], sizes = [8, 16], strides = [1, 1]} : vector<8x32xf32> to vector<8x16xf32>
    %38 = arith.mulf %36, %25 : vector<8x16xf32>
    %39 = arith.mulf %37, %27 : vector<8x16xf32>
    %40 = arith.subf %38, %39 : vector<8x16xf32>
    %41 = arith.mulf %36, %27 : vector<8x16xf32>
    %42 = arith.mulf %37, %25 : vector<8x16xf32>
    %43 = arith.addf %41, %42 : vector<8x16xf32>
    %44 = tpu.concatenate %40, %43 in 1 : vector<8x16xf32>, vector<8x16xf32> -> vector<8x32xf32>
    %cst_22 = arith.constant 0.176776692 : f32
    %45 = vector.broadcast %cst_22 : f32 to vector<8x32xf32>
    %46 = arith.mulf %44, %45 : vector<8x32xf32>
    %47 = vector.extract_strided_slice %22 {offsets = [0, 0], sizes = [8, 16], strides = [1, 1]} : vector<8x32xf32> to vector<8x16xf32>
    %48 = vector.extract_strided_slice %22 {offsets = [0, 16], sizes = [8, 16], strides = [1, 1]} : vector<8x32xf32> to vector<8x16xf32>
    %49 = arith.mulf %47, %25 : vector<8x16xf32>
    %50 = arith.mulf %48, %27 : vector<8x16xf32>
    %51 = arith.subf %49, %50 : vector<8x16xf32>
    %52 = arith.mulf %47, %27 : vector<8x16xf32>
    %53 = arith.mulf %48, %25 : vector<8x16xf32>
    %54 = arith.addf %52, %53 : vector<8x16xf32>
    %55 = tpu.concatenate %51, %54 in 1 : vector<8x16xf32>, vector<8x16xf32> -> vector<8x32xf32>
    %56 = arith.truncf %46 : vector<8x32xf32> to vector<8x32xbf16>
    %57 = arith.truncf %55 : vector<8x32xf32> to vector<8x32xbf16>
    %cst_23 = arith.constant dense<0.000000e+00> : vector<8x8xf32>
    %58 = tpu.matmul %56, %57, %cst_23 {dimension_numbers = #tpu.dot_dimension_numbers<[1], [1], [0], [0], [0, 0, 1, 0], [], []>} : vector<8x32xbf16>, vector<8x32xbf16>, vector<8x8xf32> -> vector<8x8xf32>
    %cst_24 = arith.constant -1.000000e+30 : f32
    %59 = vector.broadcast %cst_24 : f32 to vector<8x8xf32>
    %60 = arith.select %34, %58, %59 : vector<8x8xi1>, vector<8x8xf32>
    %cst_25 = arith.constant dense<0xFF800000> : vector<8xf32>
    %61 = vector.multi_reduction <maximumf>, %60, %cst_25 [1] : vector<8x8xf32> to vector<8xf32>
    %62 = vector.shape_cast %61 : vector<8xf32> to vector<8x1xf32>
    %63 = vector.broadcast %62 : vector<8x1xf32> to vector<8x8xf32>
    %64 = arith.subf %60, %63 : vector<8x8xf32>
    %65 = math.exp %64 : vector<8x8xf32>
    %cst_26 = arith.constant dense<0.000000e+00> : vector<8xf32>
    %66 = vector.multi_reduction <add>, %65, %cst_26 [1] : vector<8x8xf32> to vector<8xf32>
    %67 = vector.shape_cast %66 : vector<8xf32> to vector<8x1xf32>
    %68 = tpu.reciprocal %67 {approx = true} : vector<8x1xf32> -> vector<8x1xf32>
    %69 = vector.broadcast %68 : vector<8x1xf32> to vector<8x8xf32>
    %70 = arith.mulf %65, %69 : vector<8x8xf32>
    %71 = arith.truncf %70 : vector<8x8xf32> to vector<8x8xbf16>
    %72 = arith.truncf %23 : vector<8x32xf32> to vector<8x32xbf16>
    %cst_27 = arith.constant dense<0.000000e+00> : vector<8x32xf32>
    %73 = tpu.matmul %71, %72, %cst_27 {dimension_numbers = #tpu.dot_dimension_numbers<[1], [0], [0], [1], [0, 0, 1, 1], [], []>} : vector<8x8xbf16>, vector<8x32xbf16>, vector<8x32xf32> -> vector<8x32xf32>
    %74 = vector.extract_strided_slice %21 {offsets = [0, 32], sizes = [8, 32], strides = [1, 1]} : vector<8x128xf32> to vector<8x32xf32>
    %75 = vector.extract_strided_slice %74 {offsets = [0, 0], sizes = [8, 16], strides = [1, 1]} : vector<8x32xf32> to vector<8x16xf32>
    %76 = vector.extract_strided_slice %74 {offsets = [0, 16], sizes = [8, 16], strides = [1, 1]} : vector<8x32xf32> to vector<8x16xf32>
    %77 = arith.mulf %75, %25 : vector<8x16xf32>
    %78 = arith.mulf %76, %27 : vector<8x16xf32>
    %79 = arith.subf %77, %78 : vector<8x16xf32>
    %80 = arith.mulf %75, %27 : vector<8x16xf32>
    %81 = arith.mulf %76, %25 : vector<8x16xf32>
    %82 = arith.addf %80, %81 : vector<8x16xf32>
    %83 = tpu.concatenate %79, %82 in 1 : vector<8x16xf32>, vector<8x16xf32> -> vector<8x32xf32>
    %cst_28 = arith.constant 0.176776692 : f32
    %84 = vector.broadcast %cst_28 : f32 to vector<8x32xf32>
    %85 = arith.mulf %83, %84 : vector<8x32xf32>
    %86 = vector.extract_strided_slice %22 {offsets = [0, 0], sizes = [8, 16], strides = [1, 1]} : vector<8x32xf32> to vector<8x16xf32>
    %87 = vector.extract_strided_slice %22 {offsets = [0, 16], sizes = [8, 16], strides = [1, 1]} : vector<8x32xf32> to vector<8x16xf32>
    %88 = arith.mulf %86, %25 : vector<8x16xf32>
    %89 = arith.mulf %87, %27 : vector<8x16xf32>
    %90 = arith.subf %88, %89 : vector<8x16xf32>
    %91 = arith.mulf %86, %27 : vector<8x16xf32>
    %92 = arith.mulf %87, %25 : vector<8x16xf32>
    %93 = arith.addf %91, %92 : vector<8x16xf32>
    %94 = tpu.concatenate %90, %93 in 1 : vector<8x16xf32>, vector<8x16xf32> -> vector<8x32xf32>
    %95 = arith.truncf %85 : vector<8x32xf32> to vector<8x32xbf16>
    %96 = arith.truncf %94 : vector<8x32xf32> to vector<8x32xbf16>
    %cst_29 = arith.constant dense<0.000000e+00> : vector<8x8xf32>
    %97 = tpu.matmul %95, %96, %cst_29 {dimension_numbers = #tpu.dot_dimension_numbers<[1], [1], [0], [0], [0, 0, 1, 0], [], []>} : vector<8x32xbf16>, vector<8x32xbf16>, vector<8x8xf32> -> vector<8x8xf32>
    %cst_30 = arith.constant -1.000000e+30 : f32
    %98 = vector.broadcast %cst_30 : f32 to vector<8x8xf32>
    %99 = arith.select %34, %97, %98 : vector<8x8xi1>, vector<8x8xf32>
    %cst_31 = arith.constant dense<0xFF800000> : vector<8xf32>
    %100 = vector.multi_reduction <maximumf>, %99, %cst_31 [1] : vector<8x8xf32> to vector<8xf32>
    %101 = vector.shape_cast %100 : vector<8xf32> to vector<8x1xf32>
    %102 = vector.broadcast %101 : vector<8x1xf32> to vector<8x8xf32>
    %103 = arith.subf %99, %102 : vector<8x8xf32>
    %104 = math.exp %103 : vector<8x8xf32>
    %cst_32 = arith.constant dense<0.000000e+00> : vector<8xf32>
    %105 = vector.multi_reduction <add>, %104, %cst_32 [1] : vector<8x8xf32> to vector<8xf32>
    %106 = vector.shape_cast %105 : vector<8xf32> to vector<8x1xf32>
    %107 = tpu.reciprocal %106 {approx = true} : vector<8x1xf32> -> vector<8x1xf32>
    %108 = vector.broadcast %107 : vector<8x1xf32> to vector<8x8xf32>
    %109 = arith.mulf %104, %108 : vector<8x8xf32>
    %110 = arith.truncf %109 : vector<8x8xf32> to vector<8x8xbf16>
    %111 = arith.truncf %23 : vector<8x32xf32> to vector<8x32xbf16>
    %cst_33 = arith.constant dense<0.000000e+00> : vector<8x32xf32>
    %112 = tpu.matmul %110, %111, %cst_33 {dimension_numbers = #tpu.dot_dimension_numbers<[1], [0], [0], [1], [0, 0, 1, 1], [], []>} : vector<8x8xbf16>, vector<8x32xbf16>, vector<8x32xf32> -> vector<8x32xf32>
    %113 = vector.extract_strided_slice %21 {offsets = [0, 64], sizes = [8, 32], strides = [1, 1]} : vector<8x128xf32> to vector<8x32xf32>
    %114 = vector.extract_strided_slice %113 {offsets = [0, 0], sizes = [8, 16], strides = [1, 1]} : vector<8x32xf32> to vector<8x16xf32>
    %115 = vector.extract_strided_slice %113 {offsets = [0, 16], sizes = [8, 16], strides = [1, 1]} : vector<8x32xf32> to vector<8x16xf32>
    %116 = arith.mulf %114, %25 : vector<8x16xf32>
    %117 = arith.mulf %115, %27 : vector<8x16xf32>
    %118 = arith.subf %116, %117 : vector<8x16xf32>
    %119 = arith.mulf %114, %27 : vector<8x16xf32>
    %120 = arith.mulf %115, %25 : vector<8x16xf32>
    %121 = arith.addf %119, %120 : vector<8x16xf32>
    %122 = tpu.concatenate %118, %121 in 1 : vector<8x16xf32>, vector<8x16xf32> -> vector<8x32xf32>
    %cst_34 = arith.constant 0.176776692 : f32
    %123 = vector.broadcast %cst_34 : f32 to vector<8x32xf32>
    %124 = arith.mulf %122, %123 : vector<8x32xf32>
    %125 = vector.extract_strided_slice %22 {offsets = [0, 0], sizes = [8, 16], strides = [1, 1]} : vector<8x32xf32> to vector<8x16xf32>
    %126 = vector.extract_strided_slice %22 {offsets = [0, 16], sizes = [8, 16], strides = [1, 1]} : vector<8x32xf32> to vector<8x16xf32>
    %127 = arith.mulf %125, %25 : vector<8x16xf32>
    %128 = arith.mulf %126, %27 : vector<8x16xf32>
    %129 = arith.subf %127, %128 : vector<8x16xf32>
    %130 = arith.mulf %125, %27 : vector<8x16xf32>
    %131 = arith.mulf %126, %25 : vector<8x16xf32>
    %132 = arith.addf %130, %131 : vector<8x16xf32>
    %133 = tpu.concatenate %129, %132 in 1 : vector<8x16xf32>, vector<8x16xf32> -> vector<8x32xf32>
    %134 = arith.truncf %124 : vector<8x32xf32> to vector<8x32xbf16>
    %135 = arith.truncf %133 : vector<8x32xf32> to vector<8x32xbf16>
    %cst_35 = arith.constant dense<0.000000e+00> : vector<8x8xf32>
    %136 = tpu.matmul %134, %135, %cst_35 {dimension_numbers = #tpu.dot_dimension_numbers<[1], [1], [0], [0], [0, 0, 1, 0], [], []>} : vector<8x32xbf16>, vector<8x32xbf16>, vector<8x8xf32> -> vector<8x8xf32>
    %cst_36 = arith.constant -1.000000e+30 : f32
    %137 = vector.broadcast %cst_36 : f32 to vector<8x8xf32>
    %138 = arith.select %34, %136, %137 : vector<8x8xi1>, vector<8x8xf32>
    %cst_37 = arith.constant dense<0xFF800000> : vector<8xf32>
    %139 = vector.multi_reduction <maximumf>, %138, %cst_37 [1] : vector<8x8xf32> to vector<8xf32>
    %140 = vector.shape_cast %139 : vector<8xf32> to vector<8x1xf32>
    %141 = vector.broadcast %140 : vector<8x1xf32> to vector<8x8xf32>
    %142 = arith.subf %138, %141 : vector<8x8xf32>
    %143 = math.exp %142 : vector<8x8xf32>
    %cst_38 = arith.constant dense<0.000000e+00> : vector<8xf32>
    %144 = vector.multi_reduction <add>, %143, %cst_38 [1] : vector<8x8xf32> to vector<8xf32>
    %145 = vector.shape_cast %144 : vector<8xf32> to vector<8x1xf32>
    %146 = tpu.reciprocal %145 {approx = true} : vector<8x1xf32> -> vector<8x1xf32>
    %147 = vector.broadcast %146 : vector<8x1xf32> to vector<8x8xf32>
    %148 = arith.mulf %143, %147 : vector<8x8xf32>
    %149 = arith.truncf %148 : vector<8x8xf32> to vector<8x8xbf16>
    %150 = arith.truncf %23 : vector<8x32xf32> to vector<8x32xbf16>
    %cst_39 = arith.constant dense<0.000000e+00> : vector<8x32xf32>
    %151 = tpu.matmul %149, %150, %cst_39 {dimension_numbers = #tpu.dot_dimension_numbers<[1], [0], [0], [1], [0, 0, 1, 1], [], []>} : vector<8x8xbf16>, vector<8x32xbf16>, vector<8x32xf32> -> vector<8x32xf32>
    %152 = vector.extract_strided_slice %21 {offsets = [0, 96], sizes = [8, 32], strides = [1, 1]} : vector<8x128xf32> to vector<8x32xf32>
    %153 = vector.extract_strided_slice %152 {offsets = [0, 0], sizes = [8, 16], strides = [1, 1]} : vector<8x32xf32> to vector<8x16xf32>
    %154 = vector.extract_strided_slice %152 {offsets = [0, 16], sizes = [8, 16], strides = [1, 1]} : vector<8x32xf32> to vector<8x16xf32>
    %155 = arith.mulf %153, %25 : vector<8x16xf32>
    %156 = arith.mulf %154, %27 : vector<8x16xf32>
    %157 = arith.subf %155, %156 : vector<8x16xf32>
    %158 = arith.mulf %153, %27 : vector<8x16xf32>
    %159 = arith.mulf %154, %25 : vector<8x16xf32>
    %160 = arith.addf %158, %159 : vector<8x16xf32>
    %161 = tpu.concatenate %157, %160 in 1 : vector<8x16xf32>, vector<8x16xf32> -> vector<8x32xf32>
    %cst_40 = arith.constant 0.176776692 : f32
    %162 = vector.broadcast %cst_40 : f32 to vector<8x32xf32>
    %163 = arith.mulf %161, %162 : vector<8x32xf32>
    %164 = vector.extract_strided_slice %22 {offsets = [0, 0], sizes = [8, 16], strides = [1, 1]} : vector<8x32xf32> to vector<8x16xf32>
    %165 = vector.extract_strided_slice %22 {offsets = [0, 16], sizes = [8, 16], strides = [1, 1]} : vector<8x32xf32> to vector<8x16xf32>
    %166 = arith.mulf %164, %25 : vector<8x16xf32>
    %167 = arith.mulf %165, %27 : vector<8x16xf32>
    %168 = arith.subf %166, %167 : vector<8x16xf32>
    %169 = arith.mulf %164, %27 : vector<8x16xf32>
    %170 = arith.mulf %165, %25 : vector<8x16xf32>
    %171 = arith.addf %169, %170 : vector<8x16xf32>
    %172 = tpu.concatenate %168, %171 in 1 : vector<8x16xf32>, vector<8x16xf32> -> vector<8x32xf32>
    %173 = arith.truncf %163 : vector<8x32xf32> to vector<8x32xbf16>
    %174 = arith.truncf %172 : vector<8x32xf32> to vector<8x32xbf16>
    %cst_41 = arith.constant dense<0.000000e+00> : vector<8x8xf32>
    %175 = tpu.matmul %173, %174, %cst_41 {dimension_numbers = #tpu.dot_dimension_numbers<[1], [1], [0], [0], [0, 0, 1, 0], [], []>} : vector<8x32xbf16>, vector<8x32xbf16>, vector<8x8xf32> -> vector<8x8xf32>
    %cst_42 = arith.constant -1.000000e+30 : f32
    %176 = vector.broadcast %cst_42 : f32 to vector<8x8xf32>
    %177 = arith.select %34, %175, %176 : vector<8x8xi1>, vector<8x8xf32>
    %cst_43 = arith.constant dense<0xFF800000> : vector<8xf32>
    %178 = vector.multi_reduction <maximumf>, %177, %cst_43 [1] : vector<8x8xf32> to vector<8xf32>
    %179 = vector.shape_cast %178 : vector<8xf32> to vector<8x1xf32>
    %180 = vector.broadcast %179 : vector<8x1xf32> to vector<8x8xf32>
    %181 = arith.subf %177, %180 : vector<8x8xf32>
    %182 = math.exp %181 : vector<8x8xf32>
    %cst_44 = arith.constant dense<0.000000e+00> : vector<8xf32>
    %183 = vector.multi_reduction <add>, %182, %cst_44 [1] : vector<8x8xf32> to vector<8xf32>
    %184 = vector.shape_cast %183 : vector<8xf32> to vector<8x1xf32>
    %185 = tpu.reciprocal %184 {approx = true} : vector<8x1xf32> -> vector<8x1xf32>
    %186 = vector.broadcast %185 : vector<8x1xf32> to vector<8x8xf32>
    %187 = arith.mulf %182, %186 : vector<8x8xf32>
    %188 = arith.truncf %187 : vector<8x8xf32> to vector<8x8xbf16>
    %189 = arith.truncf %23 : vector<8x32xf32> to vector<8x32xbf16>
    %cst_45 = arith.constant dense<0.000000e+00> : vector<8x32xf32>
    %190 = tpu.matmul %188, %189, %cst_45 {dimension_numbers = #tpu.dot_dimension_numbers<[1], [0], [0], [1], [0, 0, 1, 1], [], []>} : vector<8x8xbf16>, vector<8x32xbf16>, vector<8x32xf32> -> vector<8x32xf32>
    %191 = tpu.concatenate %73, %112, %151, %190 in 1 : vector<8x32xf32>, vector<8x32xf32>, vector<8x32xf32>, vector<8x32xf32> -> vector<8x128xf32>
    %192 = arith.truncf %191 : vector<8x128xf32> to vector<8x128xbf16>
    %c0_46 = arith.constant 0 : index
    %c0_47 = arith.constant 0 : index
    %193 = vector.load %arg8[%c0_46, %c0_47] : memref<128x128xbf16, #tpu.memory_space<vmem>>, vector<128x128xbf16>
    %cst_48 = arith.constant dense<0.000000e+00> : vector<8x128xf32>
    %194 = tpu.matmul %192, %193, %cst_48 {dimension_numbers = #tpu.dot_dimension_numbers<[1], [0], [0], [1], [0, 0, 1, 1], [], []>} : vector<8x128xbf16>, vector<128x128xbf16>, vector<8x128xf32> -> vector<8x128xf32>
    %195 = arith.addf %2, %194 : vector<8x128xf32>
    %c0_49 = arith.constant 0 : index
    %c0_50 = arith.constant 0 : index
    %196 = vector.load %arg9[%c0_49, %c0_50] : memref<1x128xf32, #tpu.memory_space<vmem>>, vector<1x128xf32>
    %197 = arith.mulf %195, %195 : vector<8x128xf32>
    %cst_51 = arith.constant dense<0.000000e+00> : vector<8xf32>
    %198 = vector.multi_reduction <add>, %197, %cst_51 [1] : vector<8x128xf32> to vector<8xf32>
    %199 = vector.shape_cast %198 : vector<8xf32> to vector<8x1xf32>
    %cst_52 = arith.constant 1.280000e+02 : f32
    %200 = vector.broadcast %cst_52 : f32 to vector<8x1xf32>
    %201 = arith.divf %199, %200 : vector<8x1xf32>
    %cst_53 = arith.constant 9.99999997E-7 : f32
    %202 = vector.broadcast %cst_53 : f32 to vector<8x1xf32>
    %203 = arith.addf %201, %202 : vector<8x1xf32>
    %204 = math.rsqrt %203 : vector<8x1xf32>
    %205 = vector.broadcast %204 : vector<8x1xf32> to vector<8x128xf32>
    %206 = arith.mulf %195, %205 : vector<8x128xf32>
    %cst_54 = arith.constant 1.000000e+00 : f32
    %207 = vector.broadcast %cst_54 : f32 to vector<1x128xf32>
    %208 = arith.addf %207, %196 : vector<1x128xf32>
    %209 = vector.broadcast %208 : vector<1x128xf32> to vector<8x128xf32>
    %210 = arith.mulf %206, %209 : vector<8x128xf32>
    %211 = arith.truncf %210 : vector<8x128xf32> to vector<8x128xbf16>
    %c0_55 = arith.constant 0 : index
    %c0_56 = arith.constant 0 : index
    %212 = vector.load %arg10[%c0_55, %c0_56] : memref<128x512xbf16, #tpu.memory_space<vmem>>, vector<128x512xbf16>
    %cst_57 = arith.constant dense<0.000000e+00> : vector<8x512xf32>
    %213 = tpu.matmul %211, %212, %cst_57 {dimension_numbers = #tpu.dot_dimension_numbers<[1], [0], [0], [1], [0, 0, 1, 1], [], []>} : vector<8x128xbf16>, vector<128x512xbf16>, vector<8x512xf32> -> vector<8x512xf32>
    %214 = vector.extract_strided_slice %213 {offsets = [0, 0], sizes = [8, 256], strides = [1, 1]} : vector<8x512xf32> to vector<8x256xf32>
    %215 = vector.extract_strided_slice %213 {offsets = [0, 256], sizes = [8, 256], strides = [1, 1]} : vector<8x512xf32> to vector<8x256xf32>
    %216 = arith.mulf %214, %214 : vector<8x256xf32>
    %217 = arith.mulf %214, %216 : vector<8x256xf32>
    %cst_58 = arith.constant 4.471500e-02 : f32
    %218 = vector.broadcast %cst_58 : f32 to vector<8x256xf32>
    %219 = arith.mulf %218, %217 : vector<8x256xf32>
    %220 = arith.addf %214, %219 : vector<8x256xf32>
    %cst_59 = arith.constant 0.797884583 : f32
    %221 = vector.broadcast %cst_59 : f32 to vector<8x256xf32>
    %222 = arith.mulf %221, %220 : vector<8x256xf32>
    %223 = math.tanh %222 : vector<8x256xf32>
    %cst_60 = arith.constant 1.000000e+00 : f32
    %224 = vector.broadcast %cst_60 : f32 to vector<8x256xf32>
    %225 = arith.addf %224, %223 : vector<8x256xf32>
    %cst_61 = arith.constant 5.000000e-01 : f32
    %226 = vector.broadcast %cst_61 : f32 to vector<8x256xf32>
    %227 = arith.mulf %226, %225 : vector<8x256xf32>
    %228 = arith.mulf %214, %227 : vector<8x256xf32>
    %229 = arith.mulf %228, %215 : vector<8x256xf32>
    %230 = arith.truncf %229 : vector<8x256xf32> to vector<8x256xbf16>
    %c0_62 = arith.constant 0 : index
    %c0_63 = arith.constant 0 : index
    %231 = vector.load %arg11[%c0_62, %c0_63] : memref<256x128xbf16, #tpu.memory_space<vmem>>, vector<256x128xbf16>
    %cst_64 = arith.constant dense<0.000000e+00> : vector<8x128xf32>
    %232 = tpu.matmul %230, %231, %cst_64 {dimension_numbers = #tpu.dot_dimension_numbers<[1], [0], [0], [1], [0, 0, 1, 1], [], []>} : vector<8x256xbf16>, vector<256x128xbf16>, vector<8x128xf32> -> vector<8x128xf32>
    %233 = arith.addf %195, %232 : vector<8x128xf32>
    %234 = arith.truncf %233 : vector<8x128xf32> to vector<8x128xbf16>
    %c0_65 = arith.constant 0 : index
    %c0_66 = arith.constant 0 : index
    %c0_67 = arith.constant 0 : index
    %235 = vector.load %arg12[%c0_65, %c0_66, %c0_67] : memref<1x8x128xbf16, #tpu.memory_space<vmem>>, vector<1x8x128xbf16>
    %236 = vector.shape_cast %235 : vector<1x8x128xbf16> to vector<8x128xbf16>
    %237 = vector.shape_cast %234 : vector<8x128xbf16> to vector<1x8x128xbf16>
    tpu.vector_store %arg12[%c0_65, %c0_66, %c0_67], %237 {strides = array<i32>} : memref<1x8x128xbf16, #tpu.memory_space<vmem>>, vector<1x8x128xbf16>,
    return
  }
  func.func @transform_0(%arg0: i32) -> (i32, i32, i32) {
    %c0_i32 = arith.constant 0 : i32
    %c0_i32_0 = arith.constant 0 : i32
    %c0_i32_1 = arith.constant 0 : i32
    return %arg0, %c0_i32, %c0_i32_0 : i32, i32, i32
  }
  func.func @transform_1(%arg0: i32) -> (i32, i32, i32) {
    %c0_i32 = arith.constant 0 : i32
    %c0_i32_0 = arith.constant 0 : i32
    %c0_i32_1 = arith.constant 0 : i32
    return %arg0, %c0_i32, %c0_i32_0 : i32, i32, i32
  }
  func.func @transform_2(%arg0: i32) -> (i32, i32, i32) {
    %c0_i32 = arith.constant 0 : i32
    %c0_i32_0 = arith.constant 0 : i32
    %c0_i32_1 = arith.constant 0 : i32
    return %arg0, %c0_i32, %c0_i32_0 : i32, i32, i32
  }
  func.func @transform_3(%arg0: i32) -> (i32, i32, i32) {
    %c0_i32 = arith.constant 0 : i32
    %c0_i32_0 = arith.constant 0 : i32
    %c0_i32_1 = arith.constant 0 : i32
    return %arg0, %c0_i32, %c0_i32_0 : i32, i32, i32
  }
  func.func @transform_4(%arg0: i32) -> (i32, i32, i32) {
    %c0_i32 = arith.constant 0 : i32
    %c0_i32_0 = arith.constant 0 : i32
    %c0_i32_1 = arith.constant 0 : i32
    return %arg0, %c0_i32, %c0_i32_0 : i32, i32, i32
  }
  func.func @transform_5(%arg0: i32) -> (i32, i32) {
    %c0_i32 = arith.constant 0 : i32
    %c0_i32_0 = arith.constant 0 : i32
    %c0_i32_1 = arith.constant 0 : i32
    return %c0_i32, %c0_i32_0 : i32, i32
  }
  func.func @transform_6(%arg0: i32) -> (i32, i32) {
    %c0_i32 = arith.constant 0 : i32
    %c0_i32_0 = arith.constant 0 : i32
    %c0_i32_1 = arith.constant 0 : i32
    return %c0_i32, %c0_i32_0 : i32, i32
  }
  func.func @transform_7(%arg0: i32) -> (i32, i32) {
    %c0_i32 = arith.constant 0 : i32
    %c0_i32_0 = arith.constant 0 : i32
    %c0_i32_1 = arith.constant 0 : i32
    return %c0_i32, %c0_i32_0 : i32, i32
  }
  func.func @transform_8(%arg0: i32) -> (i32, i32) {
    %c0_i32 = arith.constant 0 : i32
    %c0_i32_0 = arith.constant 0 : i32
    %c0_i32_1 = arith.constant 0 : i32
    return %c0_i32, %c0_i32_0 : i32, i32
  }
  func.func @transform_9(%arg0: i32) -> (i32, i32) {
    %c0_i32 = arith.constant 0 : i32
    %c0_i32_0 = arith.constant 0 : i32
    %c0_i32_1 = arith.constant 0 : i32
    return %c0_i32, %c0_i32_0 : i32, i32
  }
  func.func @transform_10(%arg0: i32) -> (i32, i32) {
    %c0_i32 = arith.constant 0 : i32
    %c0_i32_0 = arith.constant 0 : i32
    %c0_i32_1 = arith.constant 0 : i32
    return %c0_i32, %c0_i32_0 : i32, i32
  }
  func.func @transform_11(%arg0: i32) -> (i32, i32, i32) {
    %c0_i32 = arith.constant 0 : i32
    %c0_i32_0 = arith.constant 0 : i32
    %c0_i32_1 = arith.constant 0 : i32
    return %arg0, %c0_i32, %c0_i32_0 : i32, i32, i32
  }
}

module attributes {stable_mosaic.version = 11 : i64} {
  func.func @kernel(%arg0: memref<2x8x128xbf16, #tpu.memory_space<vmem>>, %arg1: memref<1x128xf32, #tpu.memory_space<vmem>>, %arg2: memref<128x64xbf16, #tpu.memory_space<vmem>>, %arg3: memref<2x64xf32, #tpu.memory_space<vmem>>) attributes {dimension_semantics = [], scalar_prefetch = 0 : i64, scratch_operands = 0 : i64, tpu.core_type = #tpu.core_type<tc>} {
    %c0 = arith.constant 0 : index
    %c0_0 = arith.constant 0 : index
    %c0_1 = arith.constant 0 : index
    %0 = vector.load %arg0[%c0, %c0_0, %c0_1] : memref<2x8x128xbf16, #tpu.memory_space<vmem>>, vector<2x8x128xbf16>
    %1 = vector.extract_strided_slice %0 {offsets = [0, 7, 0], sizes = [2, 1, 128], strides = [1, 1, 1]} : vector<2x8x128xbf16> to vector<2x1x128xbf16>
    %2 = vector.shape_cast %1 : vector<2x1x128xbf16> to vector<2x128xbf16>
    %3 = arith.extf %2 : vector<2x128xbf16> to vector<2x128xf32>
    %4 = arith.mulf %3, %3 : vector<2x128xf32>
    %cst = arith.constant dense<0.000000e+00> : vector<2xf32>
    %5 = vector.multi_reduction <add>, %4, %cst [1] : vector<2x128xf32> to vector<2xf32>
    %6 = vector.shape_cast %5 : vector<2xf32> to vector<2x1xf32>
    %cst_2 = arith.constant 1.280000e+02 : f32
    %7 = vector.broadcast %cst_2 : f32 to vector<2x1xf32>
    %8 = arith.divf %6, %7 : vector<2x1xf32>
    %cst_3 = arith.constant 9.99999997E-7 : f32
    %9 = vector.broadcast %cst_3 : f32 to vector<2x1xf32>
    %10 = arith.addf %8, %9 : vector<2x1xf32>
    %11 = math.rsqrt %10 : vector<2x1xf32>
    %12 = vector.broadcast %11 : vector<2x1xf32> to vector<2x128xf32>
    %13 = arith.mulf %3, %12 : vector<2x128xf32>
    %c0_4 = arith.constant 0 : index
    %c0_5 = arith.constant 0 : index
    %14 = vector.load %arg1[%c0_4, %c0_5] : memref<1x128xf32, #tpu.memory_space<vmem>>, vector<1x128xf32>
    %cst_6 = arith.constant 1.000000e+00 : f32
    %15 = vector.broadcast %cst_6 : f32 to vector<1x128xf32>
    %16 = arith.addf %15, %14 : vector<1x128xf32>
    %17 = vector.broadcast %16 : vector<1x128xf32> to vector<2x128xf32>
    %18 = arith.mulf %13, %17 : vector<2x128xf32>
    %19 = arith.truncf %18 : vector<2x128xf32> to vector<2x128xbf16>
    %c0_7 = arith.constant 0 : index
    %c0_8 = arith.constant 0 : index
    %20 = vector.load %arg2[%c0_7, %c0_8] : memref<128x64xbf16, #tpu.memory_space<vmem>>, vector<128x64xbf16>
    %cst_9 = arith.constant dense<0.000000e+00> : vector<2x64xf32>
    %21 = tpu.matmul %19, %20, %cst_9 {dimension_numbers = #tpu.dot_dimension_numbers<[1], [0], [0], [1], [0, 0, 1, 1], [], []>} : vector<2x128xbf16>, vector<128x64xbf16>, vector<2x64xf32> -> vector<2x64xf32>
    %c0_10 = arith.constant 0 : index
    %c0_11 = arith.constant 0 : index
    %22 = vector.load %arg3[%c0_10, %c0_11] : memref<2x64xf32, #tpu.memory_space<vmem>>, vector<2x64xf32>
    tpu.vector_store %arg3[%c0_10, %c0_11], %21 {strides = array<i32>} : memref<2x64xf32, #tpu.memory_space<vmem>>, vector<2x64xf32>,
    return
  }
}

</mosaic_0001>

<bundles_post_ra>
// kernel: _lambda_.7
= control target key start
LH: loop header
LB: loop body
LE: loop exit
PB: predicated region body
PF: predicated region fallthrough
CT: control target
= control target key end

     0   :  { %s324_s0 = inlined_call_operand.vmem [shape: bf16[2,8,128], index: 0, kind: input, shape index: {}]   ;;  %s325_s1 = inlined_call_operand.vmem [shape: f32[1,128], index: 1, kind: input, shape index: {}]   ;;  %s326_s2 = inlined_call_operand.vmem [shape: bf16[128,64], index: 2, kind: input, shape index: {}]   ;;  %s327_s3 = inlined_call_operand.hbm [shape: f32[2,64], index: 3, kind: output, shape index: {}]  }
   0x1   :  { %v227_v0 = vld [vmem:[%s324_s0] sm:$0xff]  }
   0x2   :  { %8 = vsyncpa [#allocation3], 0  ;;  %v229_v1 = vunpack.c.h.bf16 %v227_v0  ;;  %vm30_vm0 = vcmask 1040384   ;;  %v289_v4 = vunpack.c.l.bf16 %v227_v0  ;;  %vm26_vm1 = vcmask 1047559   ;;  %v225_v10 = vld [vmem:[%s326_s2 + $0x38] sm:$0xff]  ;;  %v224_v12 = vld [vmem:[%s326_s2 + $0x30] sm:$0xff] }
   0x3   :  { %v264_v8 = vmov 128.0   ;;  %155 = vmatpush.bf16.msra.mxu0 %v225_v10  ;;  %v223_v14 = vld [vmem:[%s326_s2 + $0x28] sm:$0xff]  ;;  %v222_v16 = vld [vmem:[%s326_s2 + $0x20] sm:$0xff]  ;;  %v221_v18 = vld [vmem:[%s326_s2 + $0x18] sm:$0xff]  ;;  %vm103_vm9 = vcmask 1041409   ;;  %s177_s6 = sshll.u32 %s327_s3, 4  ;;  %s178_s6 = int_to_ptr.hbm [resolvable:$true] %s177_s6 }
   0x4   :  { %v20_v2 = vmul.f32 %v229_v1, %v229_v1  ;;  %v19_v6 = vmul.f32 %v289_v4, %v289_v4  ;;  %232 = vrcp.f32 %v264_v8  ;;  %v220_v20 = vld [vmem:[%s326_s2 + $0x10] sm:$0xff]  ;;  %v219_v23 = vld [vmem:[%s326_s2 + $0x8] sm:$0xff]  ;;  %v218_v25 = vld [vmem:[%s326_s2] sm:$0xff]  ;;  %vm168_vm10 = vcmask 517120  }
   0x5   :  { %v72_v33 = vld [vmem:[%s325_s1] sm:$0x1]  ;;  %s265_s1 = smov [#allocation2]  }
   0x6   :  { %v23_v3 = vrot.slane %v20_v2, 7  ;;  %v27_v7 = vsel %vm26_vm1, %v19_v6, 0.0  ;;  %v73_v36 = vadd.f32 1.0, %v72_v33  ;;  %s175_s2 = sshll.u32 %s265_s1, 4  ;;  %s176_s2 = int_to_ptr.vmem [resolvable:$true] %s175_s2 }
   0x7   :  { %156 = vmatpush.bf16.msra.mxu0 %v224_v12 }
   0x8   :  { %v31_v5 = vsel %vm30_vm0, %v23_v3, 0.0  ;;  %v75_v42 = vperm.slane %v73_v36, 0 }
   0x9   :  { %32 = vadd.xlane.f32.xlu0 %v31_v5 }
   0xa   :  { %v233_v9 = vpop.eup %232 }
   0xb   :  { %v35_v11 = vmul.f32 128.0, %v233_v9  ;;  %157 = vmatpush.bf16.msra.mxu0 %v223_v14  ;;  %vm39_vm2 = vweird.f32 %v233_v9 }
   0xd   :  { %v36_v13 = vsub.f32 1.0, %v35_v11 }
   0xf   :  { %v37_v15 = vmul.f32 %v233_v9, %v36_v13  ;;  %158 = vmatpush.bf16.msra.mxu0 %v222_v16 }
  0x11   :  { %28 = vadd.xlane.f32.xlu0 %v27_v7  ;;  %v38_v17 = vadd.f32 %v233_v9, %v37_v15 }
  0x13   :  { %159 = vmatpush.bf16.msra.mxu0 %v221_v18  ;;  %v40_v19 = vsel %vm39_vm2, %v233_v9, %v38_v17 }
  0x17   :  { %160 = vmatpush.bf16.msra.mxu0 %v220_v20 }
  0x1b   :  { %161 = vmatpush.bf16.msra.mxu0 %v219_v23 }
  0x1f   :  { %162 = vmatpush.bf16.msra.mxu0 %v218_v25 }
  0x7c   :  { %v33_v21 = vpop.xlane.xlu0 %32 }
  0x7d   :  { %v42_v22 = vmul.f32 %v40_v19, %v33_v21 }
  0x7f   :  { %v44_v24 = vadd.f32 1e-06, %v42_v22 }
  0x81   :  { %234 = vrsqrt.f32 %v44_v24  ;;  %vm61_vm4 = vweird.f32 %v44_v24 }
  0x84   :  { %v29_v26 = vpop.xlane.xlu0 %28 }
  0x85   :  { %v41_v27 = vmul.f32 %v40_v19, %v29_v26 }
  0x87   :  { %v235_v28 = vpop.eup %234  ;;  %v43_v29 = vadd.f32 1e-06, %v41_v27 }
  0x88   :  { %v56_v30 = vmul.f32 %v235_v28, %v44_v24  ;;  %vm62_vm3 = vweird.f32 %v235_v28 }
  0x89   :  { %236 = vrsqrt.f32 %v43_v29  ;;  %vm63_vm5 = vmor %vm61_vm4, %vm62_vm3  ;;  %vm51_vm7 = vweird.f32 %v43_v29 }
  0x8a   :  { %v57_v31 = vmul.f32 %v235_v28, %v56_v30 }
  0x8c   :  { %v58_v32 = vmul.f32 0.5, %v57_v31 }
  0x8e   :  { %v59_v34 = vsub.f32 1.5, %v58_v32 }
  0x8f   :  { %v237_v35 = vpop.eup %236 }
  0x90   :  { %v60_v37 = vmul.f32 %v235_v28, %v59_v34  ;;  %v46_v38 = vmul.f32 %v237_v35, %v43_v29  ;;  %vm52_vm6 = vweird.f32 %v237_v35 }
  0x91   :  { %vm53_vm8 = vmor %vm51_vm7, %vm52_vm6 }
  0x92   :  { %v64_v39 = vsel %vm63_vm5, %v235_v28, %v60_v37  ;;  %v47_v40 = vmul.f32 %v237_v35, %v46_v38 }
  0x93   :  { %v67_v41 = vrot.slane %v64_v39, 1 }
  0x94   :  { %v48_v43 = vmul.f32 0.5, %v47_v40 }
  0x95   :  { %v71_v44 = vmul.f32 %v229_v1, %v67_v41 }
  0x96   :  { %v49_v45 = vsub.f32 1.5, %v48_v43 }
  0x97   :  { %v78_v46 = vmul.f32 %v75_v42, %v71_v44 }
  0x98   :  { %v50_v47 = vmul.f32 %v237_v35, %v49_v45 }
  0x99   :  { %v80_v50 = vpack.c.bf16 %v78_v46, %v78_v46 }
  0x9a   :  { %v54_v48 = vsel %vm53_vm8, %v237_v35, %v50_v47 }
  0x9b   :  { %v70_v49 = vmul.f32 %v289_v4, %v54_v48  ;;  %v100_v53 = vunpack.c.l.b16 %v80_v50 }
  0x9d   :  { %v77_v51 = vmul.f32 %v75_v42, %v70_v49  ;;  %v102_v56 = vrot.slane %v100_v53, 6 }
  0x9f   :  { %v79_v52 = vpack.c.bf16 %v77_v51, %v77_v51 }
  0xa1   :  { %v99_v54 = vunpack.c.l.b16 %v79_v52 }
  0xa3   :  { %v101_v55 = vrot.slane %v99_v54, 7 }
  0xa5   :  { %v104_v57 = vsel %vm103_vm9, %v102_v56, %v101_v55 }
  0xa6   :  { %v105_v58 = vpack.c.b16 %v104_v57, %v104_v57 }
  0xa8   :  { %163 = vmatmul.bf16.vlgmr.msra.gmra.mxu0 %v105_v58 }
 0x125   :  { %v164_v59 = vpop.f32.mrf.mxu0 }
 0x126   :  { %169 = vst.msk [vmem:[#allocation2] sm:$0x3] %vm168_vm10, %v164_v59 }
 0x127   :  { %180 = dma.vmem_to_hbm [thread:$0]  %s176_s2, 32, %s178_s6, [#allocation3]  }
 0x12d   :  { %v166_v60 = vpop.f32.mrf.mxu0 }
 0x12e   :  { %262 = dma.done.wait [#allocation3], 32  }
 0x12f   :  { %263 = vsyncadd [#allocation3], 4294967264 }
 0x130   :  { %185 = vsyncpa [#allocation3], 1 }

// kernel: _lambda_.4
= control target key start
LH: loop header
LB: loop body
LE: loop exit
PB: predicated region body
PF: predicated region fallthrough
CT: control target
= control target key end

     0   :  { %v335_v0 = vmov 0   ;;  %vm139_vm0 = vcmask 1044480   ;;  %vm300_vm1 = vcmask 1041409   ;;  %vm302_vm2 = vcmask 1042434   ;;  %s486_s1 = inlined_call_operand.vmem [shape: f32[16,5,1], index: 1, kind: input, shape index: {}]   ;;  %s487_s0 = inlined_call_operand.vmem [shape: f32[16,5,128], index: 0, kind: input, shape index: {}]   ;;  %s488_s2 = inlined_call_operand.vmem [shape: bf16[16,128], index: 2, kind: output, shape index: {}]  }
   0x1   :  { %334 = vset.pattern.permute.xlu2 %v335_v0  ;;  %333 = vset.pattern.permute.xlu1 %v335_v0  ;;  %v31_v1 = vld [vmem:[%s486_s1 + $0x20] sm:$0x1f]  ;;  %v29_v2 = vld [vmem:[%s486_s1 + $0x10] sm:$0x1f]  ;;  %v30_v5 = vld [vmem:[%s486_s1 + $0x18] sm:$0x1f] }
   0x2   :  { %v27_v3 = vld [vmem:[%s486_s1] sm:$0x1f]  ;;  %332 = vset.pattern.permute.xlu0 %v335_v0  ;;  %65 = vperm.xlu2 %334, %v31_v1   ;;  %v28_v6 = vld [vmem:[%s486_s1 + $0x8] sm:$0x1f]  ;;  %v38_v7 = vld [vmem:[%s486_s1 + $0x58] sm:$0x1f] }
   0x3   :  { %55 = vperm.xlu1 %333, %v29_v2   ;;  %45 = vperm.xlu0 %332, %v27_v3   ;;  %v35_v4 = vld [vmem:[%s486_s1 + $0x40] sm:$0x1f]  ;;  %v37_v8 = vld [vmem:[%s486_s1 + $0x50] sm:$0x1f]  ;;  %v36_v9 = vld [vmem:[%s486_s1 + $0x48] sm:$0x1f] }
   0x4   :  { %v40_v10 = vld [vmem:[%s486_s1 + $0x68] sm:$0x1f]  ;;  %v39_v12 = vld [vmem:[%s486_s1 + $0x60] sm:$0x1f]  ;;  %v34_v13 = vld [vmem:[%s486_s1 + $0x38] sm:$0x1f] }
   0x5   :  { %v32_v11 = vld [vmem:[%s486_s1 + $0x28] sm:$0x1f]  ;;  %v41_v14 = vld [vmem:[%s486_s1 + $0x70] sm:$0x1f]  ;;  %v42_v16 = vld [vmem:[%s486_s1 + $0x78] sm:$0x1f] }
   0x6   :  { %v33_v15 = vld [vmem:[%s486_s1 + $0x30] sm:$0x1f]  ;;  %v15_v19 = vld [vmem:[%s487_s0 + $0x20] sm:$0x1f]  ;;  %v14_v36 = vld [vmem:[%s487_s0 + $0x18] sm:$0x1f] }
   0x7   :  { %v11_v23 = vld [vmem:[%s487_s0] sm:$0x1f]  ;;  %v13_v27 = vld [vmem:[%s487_s0 + $0x10] sm:$0x1f]  ;;  %v12_v37 = vld [vmem:[%s487_s0 + $0x8] sm:$0x1f] }
   0x8   :  { %v19_v24 = vld [vmem:[%s487_s0 + $0x40] sm:$0x1f]  ;;  %v22_v44 = vld [vmem:[%s487_s0 + $0x58] sm:$0x1f]  ;;  %v24_v57 = vld [vmem:[%s487_s0 + $0x68] sm:$0x1f] }
   0x9   :  { %v18_v49 = vld [vmem:[%s487_s0 + $0x38] sm:$0x1f]  ;;  %v21_v62 = vld [vmem:[%s487_s0 + $0x50] sm:$0x1f]  ;;  %v20_v63 = vld [vmem:[%s487_s0 + $0x48] sm:$0x1f] }
   0xa   :  { %85 = vperm.xlu2 %334, %v35_v4   ;;  %vm304_vm3 = vcmask 1043459   ;;  %vm306_vm4 = vcmask 1044484   ;;  %vm308_vm5 = vcmask 1045509   ;;  %vm310_vm6 = vcmask 1046534  }
   0xb   :  { %60 = vperm.xlu1 %333, %v30_v5   ;;  %50 = vperm.xlu0 %332, %v28_v6   ;;  %vm312_vm7 = vcmask 1047559  }
  0x12   :  { %100 = vperm.xlu2 %334, %v38_v7  }
  0x13   :  { %95 = vperm.xlu1 %333, %v37_v8   ;;  %90 = vperm.xlu0 %332, %v36_v9  }
  0x1a   :  { %110 = vperm.xlu2 %334, %v40_v10  }
  0x1b   :  { %70 = vperm.xlu1 %333, %v32_v11   ;;  %105 = vperm.xlu0 %332, %v39_v12  }
  0x22   :  { %80 = vperm.xlu2 %334, %v34_v13  }
  0x23   :  { %115 = vperm.xlu1 %333, %v41_v14   ;;  %75 = vperm.xlu0 %332, %v33_v15  }
  0x2b   :  { %120 = vperm.xlu0 %332, %v42_v16  }
  0x5c   :  { %v66_v17 = vpop.permute.xlu2 %65 }
  0x5d   :  { %v127_v21 = vmul.f32 %v66_v17, %v15_v19 }
  0x5f   :  { %v168_v22 = vsel %vm139_vm0, %v127_v21, 0.0 }
  0x60   :  { %v169_v25 = vrot.slane %v168_v22, 4 }
  0x62   :  { %v170_v33 = vadd.f32 %v169_v25, %v168_v22 }
  0x64   :  { %v86_v18 = vpop.permute.xlu2 %85  ;;  %v171_v39 = vrot.slane %v170_v33, 2 }
  0x65   :  { %v131_v31 = vmul.f32 %v86_v18, %v19_v24 }
  0x66   :  { %v172_v52 = vadd.f32 %v171_v39, %v170_v33 }
  0x67   :  { %v196_v35 = vsel %vm139_vm0, %v131_v31, 0.0 }
  0x68   :  { %v197_v43 = vrot.slane %v196_v35, 4  ;;  %v173_v0 = vrot.slane %v172_v52, 1 }
  0x6a   :  { %v198_v56 = vadd.f32 %v197_v43, %v196_v35 }
  0x6c   :  { %v101_v20 = vpop.permute.xlu2 %100  ;;  %v199_v6 = vrot.slane %v198_v56, 2 }
  0x6d   :  { %v134_v53 = vmul.f32 %v101_v20, %v22_v44  ;;  %v174_v20 = vadd.f32 %v173_v0, %v172_v52 }
  0x6e   :  { %v200_v21 = vadd.f32 %v199_v6, %v198_v56 }
  0x6f   :  { %v217_v1 = vsel %vm139_vm0, %v134_v53, 0.0 }
  0x70   :  { %v218_v14 = vrot.slane %v217_v1, 4 }
  0x74   :  { %v111_v29 = vpop.permute.xlu2 %110 }
  0x75   :  { %v56_v26 = vpop.permute.xlu1 %55  ;;  %v46_v28 = vpop.permute.xlu0 %45  ;;  %v136_v7 = vmul.f32 %v111_v29, %v24_v57  ;;  %v23_v29 = vld [vmem:[%s487_s0 + $0x60] sm:$0x1f] }
  0x76   :  { %v123_v30 = vmul.f32 %v46_v28, %v11_v23  ;;  %v125_v32 = vmul.f32 %v56_v26, %v13_v27  ;;  %v16_v28 = vld [vmem:[%s487_s0 + $0x28] sm:$0x1f] }
  0x77   :  { %v231_v22 = vsel %vm139_vm0, %v136_v7, 0.0 }
  0x78   :  { %v140_v34 = vsel %vm139_vm0, %v123_v30, 0.0  ;;  %v154_v38 = vsel %vm139_vm0, %v125_v32, 0.0  ;;  %v219_v30 = vadd.f32 %v218_v14, %v217_v1  ;;  %v232_v32 = vrot.slane %v231_v22, 4 }
  0x79   :  { %v141_v40 = vrot.slane %v140_v34, 4  ;;  %v155_v47 = vrot.slane %v154_v38, 4 }
  0x7b   :  { %v142_v54 = vadd.f32 %v141_v40, %v140_v34  ;;  %v156_v58 = vadd.f32 %v155_v47, %v154_v38 }
  0x7c   :  { %v81_v48 = vpop.permute.xlu2 %80 }
  0x7d   :  { %v61_v41 = vpop.permute.xlu1 %60  ;;  %v51_v42 = vpop.permute.xlu0 %50  ;;  %v130_v59 = vmul.f32 %v81_v48, %v18_v49  ;;  %v143_v2 = vrot.slane %v142_v54, 2  ;;  %v157_v10 = vrot.slane %v156_v58, 2  ;;  %v233_v49 = vadd.f32 %v232_v32, %v231_v22  ;;  %v26_v32 = vld [vmem:[%s487_s0 + $0x78] sm:$0x1f] }
  0x7e   :  { %v126_v45 = vmul.f32 %v61_v41, %v14_v36  ;;  %v124_v46 = vmul.f32 %v51_v42, %v12_v37  ;;  %v256_v37 = vpack.c.bf16 %v174_v20, %v174_v20  ;;  %v201_v41 = vrot.slane %v200_v21, 1 }
  0x7f   :  { %v189_v11 = vsel %vm139_vm0, %v130_v59, 0.0  ;;  %v144_v17 = vadd.f32 %v143_v2, %v142_v54  ;;  %v158_v24 = vadd.f32 %v157_v10, %v156_v58  ;;  %v234_v2 = vrot.slane %v233_v49, 2 }
  0x80   :  { %v161_v50 = vsel %vm139_vm0, %v126_v45, 0.0  ;;  %v147_v51 = vsel %vm139_vm0, %v124_v46, 0.0  ;;  %v190_v23 = vrot.slane %v189_v11, 4  ;;  %v220_v45 = vrot.slane %v219_v30, 2 }
  0x81   :  { %v148_v55 = vrot.slane %v147_v51, 4  ;;  %v162_v60 = vrot.slane %v161_v50, 4  ;;  %v145_v33 = vrot.slane %v144_v17, 1  ;;  %v159_v42 = vrot.slane %v158_v24, 1 }
  0x82   :  { %v191_v38 = vadd.f32 %v190_v23, %v189_v11  ;;  %v451_v53 = vunpack.c.l.b16 %v256_v37 }
  0x83   :  { %v149_v61 = vadd.f32 %v148_v55, %v147_v51  ;;  %v163_v12 = vadd.f32 %v162_v60, %v161_v50  ;;  %v146_v50 = vadd.f32 %v145_v33, %v144_v17  ;;  %v160_v56 = vadd.f32 %v159_v42, %v158_v24  ;;  %v25_v60 = vld [vmem:[%s487_s0 + $0x70] sm:$0x1f] }
  0x84   :  { %v192_v54 = vrot.slane %v191_v38, 2 }
  0x85   :  { %v150_v3 = vrot.slane %v149_v61, 2  ;;  %v96_v4 = vpop.permute.xlu1 %95  ;;  %v91_v5 = vpop.permute.xlu0 %90  ;;  %v164_v25 = vrot.slane %v163_v12, 2 }
  0x86   :  { %v133_v8 = vmul.f32 %v96_v4, %v21_v62  ;;  %v132_v9 = vmul.f32 %v91_v5, %v20_v63  ;;  %v202_v62 = vadd.f32 %v201_v41, %v200_v21  ;;  %v221_v63 = vadd.f32 %v220_v45, %v219_v30 }
  0x87   :  { %v151_v13 = vadd.f32 %v150_v3, %v149_v61  ;;  %v165_v43 = vadd.f32 %v164_v25, %v163_v12  ;;  %v17_v61 = vld [vmem:[%s487_s0 + $0x30] sm:$0x1f]  ;;  %v252_v3 = vpack.c.bf16 %v146_v50, %v146_v50  ;;  %v254_v12 = vpack.c.bf16 %v160_v56, %v160_v56 }
  0x88   :  { %v210_v15 = vsel %vm139_vm0, %v133_v8, 0.0  ;;  %v203_v16 = vsel %vm139_vm0, %v132_v9, 0.0  ;;  %v193_v8 = vadd.f32 %v192_v54, %v191_v38  ;;  %v222_v24 = vrot.slane %v221_v63, 1 }
  0x89   :  { %v211_v18 = vrot.slane %v210_v15, 4  ;;  %v204_v19 = vrot.slane %v203_v16, 4  ;;  %v152_v26 = vrot.slane %v151_v13, 1  ;;  %v166_v57 = vrot.slane %v165_v43, 1 }
  0x8a   :  { %v235_v25 = vadd.f32 %v234_v2, %v233_v49  ;;  %v286_v37 = vunpack.c.l.b16 %v254_v12  ;;  %v223_v42 = vadd.f32 %v222_v24, %v221_v63 }
  0x8b   :  { %v205_v27 = vadd.f32 %v204_v19, %v203_v16  ;;  %v212_v31 = vadd.f32 %v211_v18, %v210_v15  ;;  %v153_v44 = vadd.f32 %v152_v26, %v151_v13  ;;  %v167_v13 = vadd.f32 %v166_v57, %v165_v43 }
  0x8c   :  { %v284_v26 = vunpack.c.l.b16 %v252_v3  ;;  %v236_v43 = vrot.slane %v235_v25, 1 }
  0x8d   :  { %v206_v34 = vrot.slane %v205_v27, 2  ;;  %v71_v35 = vpop.permute.xlu1 %70  ;;  %v106_v36 = vpop.permute.xlu0 %105  ;;  %v213_v46 = vrot.slane %v212_v31, 2  ;;  %v253_v58 = vpack.c.bf16 %v153_v44, %v153_v44 }
  0x8e   :  { %v128_v39 = vmul.f32 %v71_v35, %v16_v28  ;;  %v135_v40 = vmul.f32 %v106_v36, %v23_v29  ;;  %v260_v28 = vpack.c.bf16 %v202_v62, %v202_v62  ;;  %v255_v29 = vpack.c.bf16 %v167_v13, %v167_v13 }
  0x8f   :  { %v207_v51 = vadd.f32 %v206_v34, %v205_v27  ;;  %v214_v0 = vadd.f32 %v213_v46, %v212_v31  ;;  %v285_v14 = vunpack.c.l.b16 %v253_v58  ;;  %v194_v27 = vrot.slane %v193_v8, 1 }
  0x90   :  { %v175_v47 = vsel %vm139_vm0, %v128_v39, 0.0  ;;  %v224_v48 = vsel %vm139_vm0, %v135_v40, 0.0  ;;  %v287_v46 = vunpack.c.l.b16 %v255_v29 }
  0x91   :  { %v176_v52 = vrot.slane %v175_v47, 4  ;;  %v225_v55 = vrot.slane %v224_v48, 4  ;;  %v208_v4 = vrot.slane %v207_v51, 1  ;;  %v215_v16 = vrot.slane %v214_v0, 1 }
  0x92   :  { %v301_v33 = vsel %vm300_vm1, %v285_v14, %v284_v26  ;;  %v195_v44 = vadd.f32 %v194_v27, %v193_v8 }
  0x93   :  { %v177_v59 = vadd.f32 %v176_v52, %v175_v47  ;;  %v226_v1 = vadd.f32 %v225_v55, %v224_v48  ;;  %v209_v20 = vadd.f32 %v208_v4, %v207_v51  ;;  %v216_v34 = vadd.f32 %v215_v16, %v214_v0 }
  0x94   :  { %v303_v47 = vsel %vm302_vm2, %v286_v37, %v301_v33 }
  0x95   :  { %v178_v5 = vrot.slane %v177_v59, 2  ;;  %v116_v6 = vpop.permute.xlu1 %115  ;;  %v76_v7 = vpop.permute.xlu0 %75  ;;  %v227_v9 = vrot.slane %v226_v1, 2  ;;  %v261_v38 = vpack.c.bf16 %v209_v20, %v209_v20  ;;  %v262_v50 = vpack.c.bf16 %v216_v34, %v216_v34 }
  0x96   :  { %v137_v10 = vmul.f32 %v116_v6, %v25_v60  ;;  %v129_v11 = vmul.f32 %v76_v7, %v17_v61  ;;  %v263_v60 = vpack.c.bf16 %v223_v42, %v223_v42  ;;  %v259_v61 = vpack.c.bf16 %v195_v44, %v195_v44 }
  0x97   :  { %v179_v15 = vadd.f32 %v178_v5, %v177_v59  ;;  %v228_v17 = vadd.f32 %v227_v9, %v226_v1  ;;  %v293_v55 = vunpack.c.l.b16 %v261_v38  ;;  %v292_v59 = vunpack.c.l.b16 %v260_v28 }
  0x98   :  { %v238_v18 = vsel %vm139_vm0, %v137_v10, 0.0  ;;  %v182_v19 = vsel %vm139_vm0, %v129_v11, 0.0  ;;  %v305_v62 = vsel %vm304_vm3, %v287_v46, %v303_v47  ;;  %v294_v1 = vunpack.c.l.b16 %v262_v50 }
  0x99   :  { %v180_v21 = vrot.slane %v179_v15, 1  ;;  %v239_v22 = vrot.slane %v238_v18, 4  ;;  %v183_v23 = vrot.slane %v182_v19, 4  ;;  %v229_v36 = vrot.slane %v228_v17, 1 }
  0x9a   :  { %v237_v5 = vadd.f32 %v236_v43, %v235_v25  ;;  %v314_v6 = vsel %vm300_vm1, %v293_v55, %v292_v59  ;;  %v291_v9 = vunpack.c.l.b16 %v259_v61  ;;  %v307_v10 = vsel %vm306_vm4, %v451_v53, %v305_v62 }
  0x9b   :  { %v240_v30 = vadd.f32 %v239_v22, %v238_v18  ;;  %v184_v31 = vadd.f32 %v183_v23, %v182_v19  ;;  %v181_v35 = vadd.f32 %v180_v21, %v179_v15  ;;  %v230_v52 = vadd.f32 %v229_v36, %v228_v17 }
  0x9c   :  { %v315_v13 = vsel %vm302_vm2, %v294_v1, %v314_v6  ;;  %v295_v17 = vunpack.c.l.b16 %v263_v60  ;;  %v265_v18 = vpack.c.bf16 %v237_v5, %v237_v5 }
  0x9d   :  { %v241_v39 = vrot.slane %v240_v30, 2  ;;  %v185_v40 = vrot.slane %v184_v31, 2  ;;  %v121_v41 = vpop.permute.xlu0 %120  ;;  %v257_v51 = vpack.c.bf16 %v181_v35, %v181_v35  ;;  %v264_v3 = vpack.c.bf16 %v230_v52, %v230_v52 }
  0x9e   :  { %v138_v45 = vmul.f32 %v121_v41, %v26_v32  ;;  %v316_v22 = vsel %vm304_vm3, %v295_v17, %v315_v13  ;;  %v297_v26 = vunpack.c.l.b16 %v265_v18 }
  0x9f   :  { %v242_v48 = vadd.f32 %v241_v39, %v240_v30  ;;  %v186_v49 = vadd.f32 %v185_v40, %v184_v31  ;;  %v289_v2 = vunpack.c.l.b16 %v257_v51  ;;  %v296_v15 = vunpack.c.l.b16 %v264_v3 }
  0xa0   :  { %v245_v54 = vsel %vm139_vm0, %v138_v45, 0.0 }
  0xa1   :  { %v243_v56 = vrot.slane %v242_v48, 1  ;;  %v187_v57 = vrot.slane %v186_v49, 1  ;;  %v246_v58 = vrot.slane %v245_v54, 4  ;;  %v309_v14 = vsel %vm308_vm5, %v289_v2, %v307_v10 }
  0xa2   :  { %v317_v53 = vsel %vm306_vm4, %v296_v15, %v316_v22 }
  0xa3   :  { %v188_v63 = vadd.f32 %v187_v57, %v186_v49  ;;  %v247_v0 = vadd.f32 %v246_v58, %v245_v54  ;;  %v244_v4 = vadd.f32 %v243_v56, %v242_v48  ;;  %v318_v28 = vsel %vm308_vm5, %v297_v26, %v317_v53 }
  0xa5   :  { %v258_v7 = vpack.c.bf16 %v188_v63, %v188_v63  ;;  %v248_v8 = vrot.slane %v247_v0, 2  ;;  %v266_v16 = vpack.c.bf16 %v244_v4, %v244_v4 }
  0xa7   :  { %v290_v11 = vunpack.c.l.b16 %v258_v7  ;;  %v249_v12 = vadd.f32 %v248_v8, %v247_v0  ;;  %v298_v25 = vunpack.c.l.b16 %v266_v16 }
  0xa9   :  { %v311_v19 = vsel %vm310_vm6, %v290_v11, %v309_v14  ;;  %v250_v20 = vrot.slane %v249_v12, 1  ;;  %v319_v30 = vsel %vm310_vm6, %v298_v25, %v318_v28 }
  0xaa   :  { %v313_v21 = vsel %vm312_vm7, %v291_v9, %v311_v19 }
  0xab   :  { %v321_v23 = vpack.c.b16 %v313_v21, %v313_v21  ;;  %v251_v24 = vadd.f32 %v250_v20, %v249_v12 }
  0xad   :  { %v267_v27 = vpack.c.bf16 %v251_v24, %v251_v24  ;;  %325 = vst [vmem:[%s488_s2] sm:$0xf] %v321_v23 }
  0xaf   :  { %v299_v29 = vunpack.c.l.b16 %v267_v27 }
  0xb1   :  { %v320_v31 = vsel %vm312_vm7, %v299_v29, %v319_v30 }
  0xb2   :  { %v322_v32 = vpack.c.b16 %v320_v31, %v320_v31 }
  0xb4   :  { %326 = vst [vmem:[%s488_s2 + $0x4] sm:$0xf] %v322_v32 }

// kernel: _lambda_.5
= control target key start
LH: loop header
LB: loop body
LE: loop exit
PB: predicated region body
PF: predicated region fallthrough
CT: control target
= control target key end

     0   :  { %s2108_s17 = smov 0   ;;  %s2667_s0 = inlined_call_operand.vmem [shape: bf16[2,8,128], index: 0, kind: input, shape index: {}, may-alias: {0,11}]   ;;  %s2668_s1 = inlined_call_operand.vmem [shape: s32[2,8,1], index: 1, kind: input, shape index: {}]   ;;  %s2669_s2 = inlined_call_operand.vmem [shape: s32[2,1,8], index: 2, kind: input, shape index: {}]   ;;  %s2670_s3 = inlined_call_operand.vmem [shape: f32[2,8,16], index: 3, kind: input, shape index: {}]   ;;  %s2671_s4 = inlined_call_operand.vmem [shape: f32[2,8,16], index: 4, kind: input, shape index: {}]   ;;  %s2672_s5 = inlined_call_operand.vmem [shape: f32[1,128], index: 5, kind: input, shape index: {}]   ;;  %s2673_s6 = inlined_call_operand.vmem [shape: bf16[128,192], index: 6, kind: input, shape index: {}]   ;;  %s2674_s7 = inlined_call_operand.vmem [shape: bf16[128,128], index: 7, kind: input, shape index: {}]   ;;  %s2675_s8 = inlined_call_operand.vmem [shape: f32[1,128], index: 8, kind: input, shape index: {}]   ;;  %s2676_s9 = inlined_call_operand.vmem [shape: bf16[128,512], index: 9, kind: input, shape index: {}]   ;;  %s2677_s10 = inlined_call_operand.vmem [shape: bf16[256,128], index: 10, kind: input, shape index: {}]   ;;  %s2678_s11 = inlined_call_operand.vmem [shape: bf16[2,8,128], index: 11, kind: output, shape index: {}, may-alias: {0,11}]  }
   0x1 LB: > { %s1605_s18 = sadd.s32 4294967295, %s2037_s17   ;;  %p1609_p0 = scmp.ge.s32.totalorder %s2037_s17, 1  ;;  %s2037_s17 = sphi %s2108_s17, %s21_s17  }
   0x2   : > { %p371_p1 = scmp.lt.s32.totalorder %s2037_s17, 3 }
   0x4   : > { %p372_p2 = pnand %p1609_p0, %p371_p1 }
   0x5   : > { %p424_p3 = scmp.lt.s32.totalorder (!%p372_p2), %s1605_s18, 1  ;;  %s2039_s16 = smov (!%p372_p2), 16  }
   0x6   : > { %375 = sbr.rel (%p372_p2) target bundleno = 2162 (0x872), region = 64  ;;  %s2040_s22 = smov (!%p372_p2), 48  }
   0x7   : > { %s2041_s23 = smov (!%p372_p2), 80   ;;  %s2042_s24 = smov (!%p372_p2), 112  }
   0x8   : > { %s2043_s25 = smov (!%p372_p2), 32   ;;  %s2045_s20 = smov (!%p372_p2), 64  }
   0xb   : > { %v1673_v0 = vld [vmem:[%s2673_s6 + $0x70] sm:$0xf]  ;;  %v1928_v1 = vld [vmem:[%s2673_s6 + $0x74] sm:$0xf0]  ;;  %v1927_v3 = vld [vmem:[%s2673_s6 + $0x74] sm:$0xf] }
   0xc   : > { %v1674_v2 = vor.u32 %v1928_v1, %v1673_v0  ;;  %v1675_v4 = vld [vmem:[%s2673_s6 + $0x78] sm:$0xf0]  ;;  %s2680_s18 = smov (!%p424_p3, %s1605_s18), 1  ;;  %v1665_v11 = vld [vmem:[%s2673_s6 + $0x60] sm:$0xf]  ;;  %v2044_v20 = vmov 128.0  }
   0xd   : > { %v1678_v5 = vor.u32 %v1927_v3, %v1675_v4  ;;  %s1610_s27 = sshll.u32 %s2680_s18, 2  ;;  %s2137_s12 = sshll.u32 %s2680_s18, 3  ;;  %v1926_v12 = vld [vmem:[%s2673_s6 + $0x64] sm:$0xf0]  ;;  %v1925_v13 = vld [vmem:[%s2673_s6 + $0x64] sm:$0xf]  ;;  %2005 = vrcp.f32 %v2044_v20 }
   0xe   : > { %576 = vmatpush.bf16.msra.mxu0 %v1674_v2  ;;  %s427_s30 = scalar_lea.vmem %s2667_s0, %s1610_s27  ;;  %s442_s15 = scalar_lea.vmem %s2671_s4, %s2137_s12  ;;  %v1666_v14 = vor.u32 %v1926_v12, %v1665_v11  ;;  %v1667_v15 = vld [vmem:[%s2673_s6 + $0x68] sm:$0xf0]  ;;  %v1657_v17 = vld [vmem:[%s2673_s6 + $0x50] sm:$0xf]  ;;  %v1924_v18 = vld [vmem:[%s2673_s6 + $0x54] sm:$0xf0] }
   0xf   : > { %589 = vmatpush.bf16.msra.mxu1 %v1678_v5  ;;  %v448_v6 = vld [vmem:[%s427_s30] sm:$0xf]  ;;  %s438_s21 = scalar_lea.vmem %s2670_s3, %s2137_s12  ;;  %v1670_v16 = vor.u32 %v1925_v13, %v1667_v15  ;;  %v1923_v19 = vld [vmem:[%s2673_s6 + $0x54] sm:$0xf]  ;;  %v1658_v21 = vor.u32 %v1924_v18, %v1657_v17  ;;  %v1659_v22 = vld [vmem:[%s2673_s6 + $0x58] sm:$0xf0]  ;;  %s431_s26 = scalar_lea.vmem %s2668_s1, %s2137_s12 }
  0x10   : > { %v2143_v7 = vunpack.c.l.bf16 %v448_v6  ;;  %v2145_v8 = vld [vmem:[%s442_s15] sm:$0xff]  ;;  %v1662_v23 = vor.u32 %v1923_v19, %v1659_v22  ;;  %v1922_v25 = vld [vmem:[%s2673_s6 + $0x44] sm:$0xf0]  ;;  %v1651_v28 = vld [vmem:[%s2673_s6 + $0x48] sm:$0xf0]  ;;  %vm637_vm4 = vcmask 130048   ;;  %s434_s30 = scalar_lea.vmem %s2669_s2, %s2680_s18  ;;  %s446_s14 = scalar_lea.vmem %s2678_s11, %s1610_s27 }
  0x11   : > { %613 = vrot.lane.b32.xlu1 %v2145_v8, %s2039_s16  ;;  %v2155_v10 = vld [vmem:[%s438_s21] sm:$0xff]  ;;  %v1641_v31 = vld [vmem:[%s2673_s6 + $0x30] sm:$0xf]  ;;  %v1920_v32 = vld [vmem:[%s2673_s6 + $0x34] sm:$0xf0]  ;;  %vm661_vm5 = vcmask 261120  }
  0x12   : > { %v451_v9 = vmul.f32 %v2143_v7, %v2143_v7  ;;  %577 = vmatpush.bf16.msra.mxu0 %v1666_v14  ;;  %v1649_v24 = vld [vmem:[%s2673_s6 + $0x40] sm:$0xf]  ;;  %v1921_v26 = vld [vmem:[%s2673_s6 + $0x44] sm:$0xf]  ;;  %v1919_v33 = vld [vmem:[%s2673_s6 + $0x34] sm:$0xf]  ;;  %v1642_v34 = vor.u32 %v1920_v32, %v1641_v31 }
  0x13   : > { %590 = vmatpush.bf16.msra.mxu1 %v1670_v16  ;;  %v1650_v27 = vor.u32 %v1922_v25, %v1649_v24  ;;  %v1654_v29 = vor.u32 %v1921_v26, %v1651_v28  ;;  %v2006_v30 = vpop.eup %2005  ;;  %v1643_v35 = vld [vmem:[%s2673_s6 + $0x38] sm:$0xf0]  ;;  %v1633_v38 = vld [vmem:[%s2673_s6 + $0x20] sm:$0xf]  ;;  %v1918_v39 = vld [vmem:[%s2673_s6 + $0x24] sm:$0xf0] }
  0x14   : > { %452 = vadd.xlane.f32.xlu0 %v451_v9  ;;  %v455_v36 = vmul.f32 128.0, %v2006_v30  ;;  %v1646_v37 = vor.u32 %v1919_v33, %v1643_v35  ;;  %v1917_v40 = vld [vmem:[%s2673_s6 + $0x24] sm:$0xf]  ;;  %v1634_v41 = vor.u32 %v1918_v39, %v1633_v38  ;;  %v1635_v42 = vld [vmem:[%s2673_s6 + $0x28] sm:$0xf0]  ;;  %vm459_vm0 = vweird.f32 %v2006_v30  ;;  %s2047_s12 = smov 96  }
  0x15   : > { %v1638_v44 = vor.u32 %v1917_v40, %v1635_v42  ;;  %v1625_v45 = vld [vmem:[%s2673_s6 + $0x10] sm:$0xf]  ;;  %v1916_v46 = vld [vmem:[%s2673_s6 + $0x14] sm:$0xf0]  ;;  %v1915_v47 = vld [vmem:[%s2673_s6 + $0x14] sm:$0xf] }
  0x16   : > { %578 = vmatpush.bf16.msra.mxu0 %v1658_v21  ;;  %v456_v43 = vsub.f32 1.0, %v455_v36  ;;  %v1626_v48 = vor.u32 %v1916_v46, %v1625_v45  ;;  %v1627_v49 = vld [vmem:[%s2673_s6 + $0x18] sm:$0xf0]  ;;  %v1617_v50 = vld [vmem:[%s2673_s6] sm:$0xf]  ;;  %vm682_vm7 = vcmask 64512  }
  0x17   : > { %591 = vmatpush.bf16.msra.mxu1 %v1662_v23  ;;  %v1914_v51 = vld [vmem:[%s2673_s6 + $0x4] sm:$0xf0]  ;;  %v1630_v52 = vor.u32 %v1915_v47, %v1627_v49  ;;  %v1913_v53 = vld [vmem:[%s2673_s6 + $0x4] sm:$0xf]  ;;  %v1619_v54 = vld [vmem:[%s2673_s6 + $0x8] sm:$0xf0] }
  0x18   : > { %v457_v55 = vmul.f32 %v2006_v30, %v456_v43  ;;  %v1618_v56 = vor.u32 %v1914_v51, %v1617_v50  ;;  %v1622_v57 = vor.u32 %v1913_v53, %v1619_v54  ;;  %v450_v2 = vld [vmem:[%s2672_s5] sm:$0x1]  ;;  %v2046_v50 = vmov 0  }
  0x19   : > { %v474_v4 = vadd.f32 1.0, %v450_v2  ;;  %v604_v49 = vld [vmem:[%s431_s26] sm:$0xff]  ;;  %2002 = vset.pattern.permute.xlu2 %v2046_v50  ;;  %2003 = vset.pattern.permute.xlu0 %v2046_v50  ;;  %vm702_vm8 = vcmask 1043456   ;;  %vm978_vm9 = vcmask 523264   ;;  %vm980_vm10 = vcmask 785408  }
  0x1a   : > { %579 = vmatpush.bf16.msra.mxu0 %v1650_v27  ;;  %v458_v58 = vadd.f32 %v2006_v30, %v457_v55 }
  0x1b   : > { %592 = vmatpush.bf16.msra.mxu1 %v1654_v29  ;;  %v476_v9 = vperm.slane %v474_v4, 0 }
  0x1c   : > { %v2251_v59 = vsel %vm459_vm0, %v2006_v30, %v458_v58 }
  0x1e   : > { %580 = vmatpush.bf16.msra.mxu0 %v1642_v34 }
  0x1f   : > { %593 = vmatpush.bf16.msra.mxu1 %v1646_v37 }
  0x22   : > { %581 = vmatpush.bf16.msra.mxu0 %v1634_v41 }
  0x23   : > { %594 = vmatpush.bf16.msra.mxu1 %v1638_v44 }
  0x26   : > { %582 = vmatpush.bf16.msra.mxu0 %v1626_v48 }
  0x27   : > { %595 = vmatpush.bf16.msra.mxu1 %v1630_v52 }
  0x28   : > { %624 = vrot.lane.b32.xlu0 %v2155_v10, %s2039_s16 }
  0x2a   : > { %583 = vmatpush.bf16.msra.mxu0 %v1618_v56 }
  0x2b   : > { %596 = vmatpush.bf16.msra.mxu1 %v1622_v57 }
  0x30   : > { %723 = vrot.lane.b32.xlu0 %v2145_v8, %s2040_s22 }
  0x38   : > { %805 = vrot.lane.b32.xlu0 %v2145_v8, %s2041_s23 }
  0x40   : > { %887 = vrot.lane.b32.xlu0 %v2145_v8, %s2042_s24 }
  0x48   : > { %719 = vrot.lane.b32.xlu0 %v2155_v10, %s2043_s25 }
  0x83   : > { %v614_v22 = vpop.permute.xlu1 %613 }
  0x87   : > { %v453_v60 = vpop.xlane.xlu0 %452 }
  0x88   : > { %v461_v61 = vmul.f32 %v2251_v59, %v453_v60 }
  0x8a   : > { %v462_v62 = vadd.f32 1e-06, %v461_v61 }
  0x8c   : > { %2007 = vrsqrt.f32 %v462_v62  ;;  %vm469_vm2 = vweird.f32 %v462_v62 }
  0x92   : > { %v2008_v63 = vpop.eup %2007 }
  0x93   : > { %v464_v0 = vmul.f32 %v2008_v63, %v462_v62  ;;  %vm470_vm1 = vweird.f32 %v2008_v63 }
  0x94   : > { %vm471_vm3 = vmor %vm469_vm2, %vm470_vm1 }
  0x95   : > { %v465_v1 = vmul.f32 %v2008_v63, %v464_v0 }
  0x97   : > { %v466_v3 = vmul.f32 0.5, %v465_v1 }
  0x99   : > { %v467_v5 = vsub.f32 1.5, %v466_v3 }
  0x9a   : > { %v625_v15 = vpop.permute.xlu0 %624 }
  0x9b   : > { %v468_v6 = vmul.f32 %v2008_v63, %v467_v5 }
  0x9d   : > { %v472_v11 = vsel %vm471_vm3, %v2008_v63, %v468_v6  ;;  %v2323_v63 = vld [vmem:[%s434_s30] ss:$0 sm:$0xff] }
  0x9e   : > { %v473_v12 = vmul.f32 %v472_v11, %v2143_v7 }
  0xa0   : > { %v478_v13 = vmul.f32 %v476_v9, %v473_v12 }
  0xa2   : > { %v479_v14 = vpack.c.bf16 %v478_v13, %v478_v13  ;;  %v724_v16 = vpop.permute.xlu0 %723 }
  0xa4   : > { %584 = vmatmul.bf16.vlgmr.msra.gmra.mxu0 %v479_v14  ;;  %597 = vmatmul.bf16.vlgmr.msra.gmra.mxu1 %v479_v14 }
  0xaa   : > { %v806_v53 = vpop.permute.xlu0 %805 }
  0xb2   : > { %v888_v55 = vpop.permute.xlu0 %887 }
  0xba   : > { %v720_v56 = vpop.permute.xlu0 %719 }
 0x121   : > { %v2258_v17 = vpop.f32.mrf.mxu0  ;;  %v2260_v18 = vpop.f32.mrf.mxu1 }
 0x122   : > { %v648_v19 = vmul.f32 %v625_v15, %v2260_v18  ;;  %v627_v20 = vmul.f32 %v625_v15, %v2258_v17  ;;  %v726_v21 = vmul.f32 %v724_v16, %v2258_v17  ;;  %v641_v25 = vmul.f32 %v614_v22, %v2260_v18 }
 0x123   : > { %v616_v26 = vmul.f32 %v614_v22, %v2258_v17  ;;  %v647_v27 = vmul.f32 %v2145_v8, %v2260_v18  ;;  %v622_v31 = vmul.f32 %v2145_v8, %v2258_v17  ;;  %v640_v34 = vmul.f32 %v2155_v10, %v2260_v18 }
 0x124   : > { %650 = vrot.lane.b32.xlu1 %v648_v19, %s2042_s24  ;;  %629 = vrot.lane.b32.xlu2 %v627_v20, %s2042_s24  ;;  %v611_v41 = vmul.f32 %v2155_v10, %v2258_v17  ;;  %v695_v54 = vpack.c.bf16 %v2260_v18, %v2260_v18  ;;  %v890_v57 = vmul.f32 %v888_v55, %v2258_v17 }
 0x125   : > { %728 = vrot.lane.b32.xlu0 %v726_v21, %s2042_s24  ;;  %v722_v60 = vmul.f32 %v720_v56, %v2258_v17  ;;  %v808_v11 = vmul.f32 %v806_v53, %v2258_v17 }
 0x129   : > { %v587_v23 = vpop.f32.mrf.mxu0  ;;  %v600_v24 = vpop.f32.mrf.mxu1 }
 0x12c   : > { %643 = vrot.lane.b32.xlu2 %v641_v25, %s2042_s24 }
 0x12d   : > { %801 = vrot.lane.b32.xlu0 %v2155_v10, %s2045_s20 }
 0x134   : > { %618 = vrot.lane.b32.xlu2 %v616_v26, %s2042_s24 }
 0x13c   : > { %607 = vperm.xlu2 %2002, %v604_v49  }
 0x17e   : > { %v630_v30 = vpop.permute.xlu2 %629 }
 0x17f   : > { %v632_v32 = vadd.f32 %v630_v30, %v622_v31 }
 0x186   : > { %v644_v33 = vpop.permute.xlu2 %643 }
 0x187   : > { %v646_v35 = vsub.f32 %v640_v34, %v644_v33 }
 0x18e   : > { %v619_v39 = vpop.permute.xlu2 %618 }
 0x18f   : > { %v621_v42 = vsub.f32 %v611_v41, %v619_v39 }
 0x196   : > { %v651_v28 = vpop.permute.xlu1 %650  ;;  %v2325_v0 = vpop.permute.xlu2 %607 }
 0x197   : > { %v653_v29 = vadd.f32 %v651_v28, %v647_v27  ;;  %v729_v58 = vpop.permute.xlu0 %728  ;;  %vm610_vm6 = vcmp.ge.s32.totalorder %v2325_v0, %v2323_v63 }
 0x198   : > { %v731_v61 = vsub.f32 %v722_v60, %v729_v58 }
 0x199   : > { %655 = vrot.lane.b32.xlu1 %v653_v29, %s2039_s16 }
 0x19f   : > { %v802_v62 = vpop.permute.xlu0 %801 }
 0x1a1   : > { %634 = vrot.lane.b32.xlu1 %v632_v32, %s2039_s16 }
 0x1a9   : > { %736 = vrot.lane.b32.xlu1 %v2155_v10, %s2040_s22 }
 0x1b1   : > { %818 = vrot.lane.b32.xlu1 %v2155_v10, %s2041_s23 }
 0x1b9   : > { %900 = vrot.lane.b32.xlu1 %v2155_v10, %s2042_s24 }
 0x1c1   : > { %732 = vrot.lane.b32.xlu1 %v2145_v8, %s2043_s25 }
 0x20b   : > { %v656_v36 = vpop.permute.xlu1 %655 }
 0x20c   : > { %v658_v37 = vsel %vm637_vm4, %v646_v35, %v656_v36 }
 0x20d   : > { %v660_v38 = vpack.c.bf16 %v658_v37, %v658_v37 }
 0x20f   : > { %v2292_v40 = vsel %vm661_vm5, %v660_v38, 0 }
 0x210   : > { %675 = vmatpush.bf16.xpose.msra.mxu2 %v2292_v40  ;;  %930 = vmatpush.bf16.xpose.msrb.mxu1 %v2292_v40 }
 0x213   : > { %v635_v43 = vpop.permute.xlu1 %634 }
 0x214   : > { %v638_v44 = vsel %vm637_vm4, %v621_v42, %v635_v43 }
 0x215   : > { %v639_v45 = vmul.f32 0.17677669, %v638_v44 }
 0x217   : > { %v659_v46 = vpack.c.bf16 %v639_v45, %v639_v45 }
 0x219   : > { %1679 = vmatmul.msk.bf16.vlgmr.msra.gmra.mxu2 %vm661_vm5, %v659_v46 }
 0x21b   : > { %v737_v47 = vpop.permute.xlu1 %736 }
 0x21c   : > { %v739_v48 = vmul.f32 %v737_v47, %v2258_v17 }
 0x21e   : > { %741 = vrot.lane.b32.xlu1 %v739_v48, %s2042_s24 }
 0x223   : > { %v819_v51 = vpop.permute.xlu1 %818 }
 0x224   : > { %v821_v52 = vmul.f32 %v819_v51, %v2258_v17 }
 0x226   : > { %814 = vrot.lane.b32.xlu1 %v2145_v8, %s2045_s20  ;;  %823 = vrot.lane.b32.xlu0 %v821_v52, %s2042_s24 }
 0x22b   : > { %v901_v9 = vpop.permute.xlu1 %900 }
 0x22c   : > { %v903_v14 = vmul.f32 %v901_v9, %v2258_v17 }
 0x22e   : > { %697 = vrot.lane.b32.xlu0 %v695_v54, %s2047_s12 }
 0x233   : > { %v733_v12 = vpop.permute.xlu1 %732 }
 0x234   : > { %v735_v15 = vmul.f32 %v733_v12, %v2258_v17 }
 0x236   : > { %883 = vrot.lane.b32.xlu0 %v2155_v10, %s2047_s12 }
 0x23e   : > { %892 = vrot.lane.b32.xlu0 %v890_v57, %s2042_s24 }
 0x246   : > { %746 = vrot.lane.b32.xlu0 %v731_v61, %s2047_s12 }
 0x290   : > { %v742_v13 = vpop.permute.xlu1 %741 }
 0x291   : > { %v744_v16 = vadd.f32 %v742_v13, %v735_v15 }
 0x298   : > { %v824_v1 = vpop.permute.xlu0 %823  ;;  %v815_v18 = vpop.permute.xlu1 %814 }
 0x299   : > { %v817_v19 = vmul.f32 %v815_v18, %v2258_v17 }
 0x29b   : > { %v826_v20 = vadd.f32 %v824_v1, %v817_v19 }
 0x29c   : > { %v677_v10 = vpop.f32.mrf.mxu2 }
 0x29d   : > { %v681_v2 = vsel %vm610_vm6, %v677_v10, -1e+30 }
 0x29e   : > { %v683_v3 = vsel %vm682_vm7, %v681_v2, -inf }
 0x29f   : > { %684 = vmax.xlane.f32.xlu2 %v683_v3 }
 0x2a0   : > { %v698_v4 = vpop.permute.xlu0 %697 }
 0x2a1   : > { %v704_v5 = vsel %vm702_vm8, %v698_v4, 0 }
 0x2a2   : > { %713 = vmatpush.bf16.msra.mxu3 %v704_v5  ;;  %795 = vmatpush.bf16.msrb.mxu2 %v704_v5 }
 0x2a3   : > { %959 = vmatpush.bf16.msra.mxu1 %v704_v5 }
 0x2a4   : > { %v679_v6 = vpop.f32.mrf.mxu2 }
 0x2a6   : > { %766 = vmatpush.bf16.xpose.msrb.mxu3 %v2292_v40  ;;  %877 = vmatpush.bf16.msra.mxu2 %v704_v5 }
 0x2a8   : > { %v884_v29 = vpop.permute.xlu0 %883 }
 0x2a9   : > { %v886_v34 = vmul.f32 %v884_v29, %v2258_v17 }
 0x2b0   : > { %v893_v33 = vpop.permute.xlu0 %892 }
 0x2b1   : > { %v895_v35 = vsub.f32 %v886_v34, %v893_v33  ;;  %v1936_v34 = vld [vmem:[%s2674_s7 + $0x38] sm:$0xff] }
 0x2b7   : > { %810 = vrot.lane.b32.xlu2 %v808_v11, %s2042_s24 }
 0x2b8   : > { %v747_v38 = vpop.permute.xlu0 %746 }
 0x2bf   : > { %896 = vrot.lane.b32.xlu2 %v2145_v8, %s2047_s12  ;;  %v804_v8 = vmul.f32 %v802_v62, %v2258_v17 }
 0x2c7   : > { %905 = vrot.lane.b32.xlu2 %v903_v14, %s2042_s24 }
 0x2cf   : > { %750 = vrot.lane.b32.xlu2 %v744_v16, %s2042_s24 }
 0x2d7   : > { %832 = vrot.lane.b32.xlu2 %v826_v20, %s2041_s23 }
 0x312   : > { %v685_v21 = vpop.xlane.xlu2 %684 }
 0x313   : > { %v686_v22 = vsub.f32 %v681_v2, %v685_v21 }
 0x315   : > { %v687_v23 = vmul.f32 1.442695, %v686_v22 }
 0x317   : > { %2009 = vpow2.f32 %v687_v23 }
 0x31a   : > { %v811_v24 = vpop.permute.xlu2 %810 }
 0x31b   : > { %v813_v25 = vsub.f32 %v804_v8, %v811_v24 }
 0x31d   : > { %v2010_v26 = vpop.eup %2009  ;;  %828 = vrot.lane.b32.xlu0 %v813_v25, %s2045_s20 }
 0x31e   : > { %v689_v27 = vsel %vm682_vm7, %v2010_v26, 0.0 }
 0x31f   : > { %690 = vadd.xlane.f32.xlu1 %v689_v27 }
 0x322   : > { %v897_v28 = vpop.permute.xlu2 %896 }
 0x323   : > { %v899_v30 = vmul.f32 %v897_v28, %v2258_v17 }
 0x32a   : > { %v906_v31 = vpop.permute.xlu2 %905 }
 0x32b   : > { %v908_v32 = vadd.f32 %v906_v31, %v899_v30 }
 0x32d   : > { %914 = vrot.lane.b32.xlu0 %v908_v32, %s2040_s22 }
 0x332   : > { %v751_v42 = vpop.permute.xlu2 %750 }
 0x333   : > { %v753_v44 = vsel %vm637_vm4, %v747_v38, %v751_v42 }
 0x334   : > { %v754_v45 = vmul.f32 0.17677669, %v753_v44 }
 0x336   : > { %v755_v48 = vpack.c.bf16 %v754_v45, %v754_v45 }
 0x338   : > { %910 = vrot.lane.b32.xlu1 %v895_v35, %s2043_s25  ;;  %v1935_v35 = vld [vmem:[%s2674_s7 + $0x30] sm:$0xff] }
 0x33a   : > { %v833_v51 = vpop.permute.xlu2 %832 }
 0x38f   : > { %v829_v43 = vpop.permute.xlu0 %828 }
 0x390   : > { %v835_v52 = vsel %vm637_vm4, %v829_v43, %v833_v51 }
 0x392   : > { %v691_v36 = vpop.xlane.xlu1 %690 }
 0x393   : > { %2011 = vrcp.f32 %v691_v36  ;;  %v1934_v36 = vld [vmem:[%s2674_s7 + $0x28] sm:$0xff] }
 0x399   : > { %v2012_v37 = vpop.eup %2011 }
 0x39a   : > { %v693_v39 = vmul.f32 %v2012_v37, %v2010_v26 }
 0x39c   : > { %v694_v41 = vpack.c.bf16 %v693_v39, %v693_v39  ;;  %v1933_v39 = vld [vmem:[%s2674_s7 + $0x20] sm:$0xff] }
 0x39e   : > { %1680 = vmatmul.msk.bf16.vlgmr.msra.gmra.mxu3 %vm682_vm7, %v694_v41  ;;  %v1932_v41 = vld [vmem:[%s2674_s7 + $0x18] sm:$0xff] }
 0x39f   : > { %848 = vmatpush.bf16.xpose.msra.mxu3 %v2292_v40  ;;  %v915_v46 = vpop.permute.xlu0 %914  ;;  %v836_v40 = vmul.f32 0.17677669, %v835_v52 }
 0x3a1   : > { %v837_v53 = vpack.c.bf16 %v836_v40, %v836_v40 }
 0x3aa   : > { %v911_v17 = vpop.permute.xlu1 %910 }
 0x3ab   : > { %v917_v47 = vsel %vm637_vm4, %v911_v17, %v915_v46  ;;  %v1931_v46 = vld [vmem:[%s2674_s7 + $0x10] sm:$0xff]  ;;  %v1930_v17 = vld [vmem:[%s2674_s7 + $0x8] sm:$0xff] }
 0x3ac   : > { %v918_v49 = vmul.f32 0.17677669, %v917_v47  ;;  %v1929_v47 = vld [vmem:[%s2674_s7] sm:$0xff] }
 0x3ae   : > { %v919_v50 = vpack.c.bf16 %v918_v49, %v918_v49  ;;  %1681 = vmatmul.msk.bf16.vlgmr.msrb.gmra.mxu3 %vm661_vm5, %v755_v48 }
 0x3af   : > { %1047 = vmatpush.bf16.msrb.mxu3 %v1936_v34  ;;  %v1953_v34 = vld [vmem:[%s2676_s9 + $0x84] sm:$0xf] }
 0x3b0   : > { %1685 = vmatmul.msk.bf16.vlgmr.msrb.gmra.mxu1 %vm661_vm5, %v919_v50 }
 0x3b3   : > { %1048 = vmatpush.bf16.msrb.mxu3 %v1935_v35 }
 0x3b7   : > { %1049 = vmatpush.bf16.msrb.mxu3 %v1934_v36  ;;  %v1787_v36 = vld [vmem:[%s2676_s9 + $0x90] sm:$0xf0] }
 0x3bb   : > { %1050 = vmatpush.bf16.msrb.mxu3 %v1933_v39  ;;  %v1790_v39 = vor.u32 %v1953_v34, %v1787_v36 }
 0x3be   : > { %1683 = vmatmul.msk.bf16.vlgmr.msra.gmra.mxu3 %vm661_vm5, %v837_v53 }
 0x3bf   : > { %1051 = vmatpush.bf16.msrb.mxu3 %v1932_v41 }
 0x3c3   : > { %1052 = vmatpush.bf16.msrb.mxu3 %v1931_v46  ;;  %v1951_v46 = vld [vmem:[%s2676_s9 + $0x6c] sm:$0xf0] }
 0x3c7   : > { %1053 = vmatpush.bf16.msrb.mxu3 %v1930_v17  ;;  %v1949_v17 = vld [vmem:[%s2676_s9 + $0x64] sm:$0xf] }
 0x3cb   : > { %1054 = vmatpush.bf16.msrb.mxu3 %v1929_v47 }
 0x421   : > { %v2359_v54 = vpop.f32.mrf.mxu3 }
 0x429   : > { %v717_v55 = vpop.f32.mrf.mxu3 }
 0x42a   : > { %v1833_v55 = vld [vmem:[%s2676_s9 + $0xe0] sm:$0xf] }
 0x42d   : > { %v932_v56 = vpop.f32.mrf.mxu1 }
 0x42e   : > { %v936_v57 = vsel %vm610_vm6, %v932_v56, -1e+30  ;;  %v1967_v56 = vld [vmem:[%s2676_s9 + $0xec] sm:$0xf0] }
 0x42f   : > { %v937_v58 = vsel %vm682_vm7, %v936_v57, -inf }
 0x430   : > { %938 = vmax.xlane.f32.xlu1 %v937_v58  ;;  %v1834_v58 = vor.u32 %v1967_v56, %v1833_v55  ;;  %v1753_v56 = vld [vmem:[%s2676_s9 + $0x40] sm:$0xf] }
 0x431   : > { %v768_v60 = vpop.f32.mrf.mxu3 }
 0x432   : > { %v772_v61 = vsel %vm610_vm6, %v768_v60, -1e+30  ;;  %v1841_v60 = vld [vmem:[%s2676_s9 + $0xe8] sm:$0xf] }
 0x433   : > { %v773_v62 = vsel %vm682_vm7, %v772_v61, -inf }
 0x434   : > { %774 = vmax.xlane.f32.xlu2 %v773_v62 }
 0x435   : > { %v934_v1 = vpop.f32.mrf.mxu1 }
 0x439   : > { %v770_v10 = vpop.f32.mrf.mxu3 }
 0x43a   : > { %v1966_v10 = vld [vmem:[%s2676_s9 + $0xec] sm:$0xf] }
 0x441   : > { %v850_v2 = vpop.f32.mrf.mxu3 }
 0x442   : > { %v854_v3 = vsel %vm610_vm6, %v850_v2, -1e+30  ;;  %v1843_v2 = vld [vmem:[%s2676_s9 + $0xf8] sm:$0xf0] }
 0x443   : > { %v855_v4 = vsel %vm682_vm7, %v854_v3, -inf }
 0x444   : > { %856 = vmax.xlane.f32.xlu0 %v855_v4 }
 0x449   : > { %v852_v5 = vpop.f32.mrf.mxu3 }
 0x4a3   : > { %v939_v6 = vpop.xlane.xlu1 %938 }
 0x4a4   : > { %v940_v12 = vsub.f32 %v936_v57, %v939_v6  ;;  %v1965_v57 = vld [vmem:[%s2676_s9 + $0xe4] sm:$0xf] }
 0x4a6   : > { %v941_v14 = vmul.f32 1.442695, %v940_v12  ;;  %v1963_v12 = vld [vmem:[%s2676_s9 + $0xcc] sm:$0xf0] }
 0x4a7   : > { %v775_v9 = vpop.xlane.xlu2 %774 }
 0x4a8   : > { %v776_v11 = vsub.f32 %v772_v61, %v775_v9  ;;  %v1968_v61 = vld [vmem:[%s2676_s9 + $0xf4] sm:$0xf0] }
 0x4a9   : > { %v1842_v1 = vor.u32 %v1968_v61, %v1841_v60  ;;  %v1755_v60 = vld [vmem:[%s2676_s9 + $0x50] sm:$0xf0]  ;;  %v1761_v61 = vld [vmem:[%s2676_s9 + $0x48] sm:$0xf] }
 0x4aa   : > { %v777_v13 = vmul.f32 1.442695, %v776_v11  ;;  %v1817_v11 = vld [vmem:[%s2676_s9 + $0xc0] sm:$0xf] }
 0x4ab   : > { %1302 = vmatpush.bf16.msrb.mxu1 %v1842_v1 }
 0x4ac   : > { %2013 = vpow2.f32 %v777_v13  ;;  %v1961_v13 = vld [vmem:[%s2676_s9 + $0xc4] sm:$0xf] }
 0x4ad   : > { %2015 = vpow2.f32 %v941_v14  ;;  %v1818_v14 = vor.u32 %v1963_v12, %v1817_v11  ;;  %v1941_v11 = vld [vmem:[%s2676_s9 + $0x24] sm:$0xf] }
 0x4b2   : > { %v2014_v15 = vpop.eup %2013 }
 0x4b3   : > { %v779_v16 = vsel %vm682_vm7, %v2014_v15, 0.0  ;;  %v2016_v19 = vpop.eup %2015 }
 0x4b4   : > { %780 = vadd.xlane.f32.xlu2 %v779_v16  ;;  %v943_v20 = vsel %vm682_vm7, %v2016_v19, 0.0  ;;  %v1964_v16 = vld [vmem:[%s2676_s9 + $0xd4] sm:$0xf0] }
 0x4b7   : > { %v857_v18 = vpop.xlane.xlu0 %856 }
 0x4b8   : > { %v858_v63 = vsub.f32 %v854_v3, %v857_v18  ;;  %v1846_v3 = vor.u32 %v1966_v10, %v1843_v2  ;;  %v1946_v2 = vld [vmem:[%s2676_s9 + $0x4c] sm:$0xf] }
 0x4ba   : > { %v859_v0 = vmul.f32 1.442695, %v858_v63  ;;  %1315 = vmatpush.bf16.msra.mxu3 %v1846_v3  ;;  %v1962_v63 = vld [vmem:[%s2676_s9 + $0xcc] sm:$0xf]  ;;  %v1763_v3 = vld [vmem:[%s2676_s9 + $0x58] sm:$0xf0] }
 0x4bc   : > { %2017 = vpow2.f32 %v859_v0  ;;  %944 = vadd.xlane.f32.xlu2 %v943_v20  ;;  %v1827_v0 = vld [vmem:[%s2676_s9 + $0xd8] sm:$0xf0] }
 0x4bd   : > { %v1830_v20 = vor.u32 %v1962_v63, %v1827_v0  ;;  %v1721_v63 = vld [vmem:[%s2676_s9] sm:$0xf] }
 0x4bf   : > { %1316 = vmatpush.bf16.msra.mxu3 %v1830_v20  ;;  %v1939_v20 = vld [vmem:[%s2676_s9 + $0xc] sm:$0xf0] }
 0x4c2   : > { %v2018_v21 = vpop.eup %2017 }
 0x4c3   : > { %v861_v22 = vsel %vm682_vm7, %v2018_v21, 0.0 }
 0x4c4   : > { %862 = vadd.xlane.f32.xlu0 %v861_v22  ;;  %v1959_v22 = vld [vmem:[%s2676_s9 + $0xac] sm:$0xf0] }
 0x527   : > { %v781_v23 = vpop.xlane.xlu2 %780 }
 0x528   : > { %2019 = vrcp.f32 %v781_v23  ;;  %v1957_v23 = vld [vmem:[%s2676_s9 + $0xa4] sm:$0xf] }
 0x52e   : > { %v2020_v8 = vpop.eup %2019 }
 0x52f   : > { %v783_v24 = vmul.f32 %v2020_v8, %v2014_v15  ;;  %v945_v25 = vpop.xlane.xlu2 %944  ;;  %v1825_v15 = vld [vmem:[%s2676_s9 + $0xc8] sm:$0xf] }
 0x530   : > { %2021 = vrcp.f32 %v945_v25  ;;  %v1809_v25 = vld [vmem:[%s2676_s9 + $0xa8] sm:$0xf] }
 0x531   : > { %v784_v26 = vpack.c.bf16 %v783_v24, %v783_v24  ;;  %v1803_v24 = vld [vmem:[%s2676_s9 + $0xb0] sm:$0xf0] }
 0x533   : > { %1682 = vmatmul.msk.bf16.vlgmr.msrb.gmra.mxu2 %vm682_vm7, %v784_v26  ;;  %v1960_v26 = vld [vmem:[%s2676_s9 + $0xb4] sm:$0xf0] }
 0x534   : > { %1276 = vmatpush.bf16.msrb.mxu2 %v1834_v58  ;;  %v1945_v58 = vld [vmem:[%s2676_s9 + $0x44] sm:$0xf] }
 0x535   : > { %v1758_v1 = vor.u32 %v1945_v58, %v1755_v60  ;;  %v1977_v58 = vld [vmem:[%s2677_s10 + $0x40] sm:$0xff] }
 0x536   : > { %v2022_v27 = vpop.eup %2021  ;;  %v1969_v60 = vld [vmem:[%s2677_s10] sm:$0xff] }
 0x537   : > { %v947_v28 = vmul.f32 %v2022_v27, %v2016_v19  ;;  %v863_v29 = vpop.xlane.xlu0 %862  ;;  %v1826_v19 = vor.u32 %v1964_v16, %v1825_v15  ;;  %v1806_v27 = vor.u32 %v1957_v23, %v1803_v24  ;;  %v1722_v23 = vor.u32 %v1939_v20, %v1721_v63  ;;  %v1729_v24 = vld [vmem:[%s2676_s9 + $0x8] sm:$0xf] }
 0x538   : > { %2023 = vrcp.f32 %v863_v29  ;;  %1277 = vmatpush.bf16.msrb.mxu2 %v1818_v14  ;;  %v1958_v29 = vld [vmem:[%s2676_s9 + $0xac] sm:$0xf]  ;;  %v1745_v14 = vld [vmem:[%s2676_s9 + $0x28] sm:$0xf] }
 0x539   : > { %v948_v30 = vpack.c.bf16 %v947_v28, %v947_v28  ;;  %1303 = vmatpush.bf16.msrb.mxu1 %v1826_v19  ;;  %v1810_v28 = vor.u32 %v1960_v26, %v1809_v25  ;;  %v1747_v19 = vld [vmem:[%s2676_s9 + $0x38] sm:$0xf0]  ;;  %v1940_v25 = vld [vmem:[%s2676_s9 + $0x14] sm:$0xf0]  ;;  %v1938_v26 = vld [vmem:[%s2676_s9 + $0xc] sm:$0xf] }
 0x53b   : > { %1686 = vmatmul.msk.bf16.vlgmr.msra.gmra.mxu1 %vm682_vm7, %v948_v30  ;;  %v1811_v30 = vld [vmem:[%s2676_s9 + $0xb8] sm:$0xf0] }
 0x53d   : > { %1304 = vmatpush.bf16.msrb.mxu1 %v1810_v28  ;;  %v1731_v28 = vld [vmem:[%s2676_s9 + $0x18] sm:$0xf0] }
 0x53e   : > { %v2024_v31 = vpop.eup %2023 }
 0x53f   : > { %v865_v32 = vmul.f32 %v2024_v31, %v2018_v21  ;;  %v1801_v21 = vld [vmem:[%s2676_s9 + $0xa0] sm:$0xf]  ;;  %v1814_v31 = vor.u32 %v1958_v29, %v1811_v30  ;;  %v1734_v29 = vor.u32 %v1938_v26, %v1731_v28  ;;  %v1984_v30 = vld [vmem:[%s2677_s10 + $0x78] sm:$0xff] }
 0x540   : > { %v1802_v8 = vor.u32 %v1959_v22, %v1801_v21  ;;  %v1937_v21 = vld [vmem:[%s2676_s9 + $0x4] sm:$0xf]  ;;  %v1723_v22 = vld [vmem:[%s2676_s9 + $0x10] sm:$0xf0] }
 0x541   : > { %v866_v33 = vpack.c.bf16 %v865_v32, %v865_v32  ;;  %v1785_v32 = vld [vmem:[%s2676_s9 + $0x80] sm:$0xf]  ;;  %1317 = vmatpush.bf16.msra.mxu3 %v1814_v31 }
 0x542   : > { %1278 = vmatpush.bf16.msrb.mxu2 %v1802_v8  ;;  %v1726_v8 = vor.u32 %v1937_v21, %v1723_v22 }
 0x543   : > { %1684 = vmatmul.msk.bf16.vlgmr.msra.gmra.mxu2 %vm682_vm7, %v866_v33  ;;  %v1955_v33 = vld [vmem:[%s2676_s9 + $0x8c] sm:$0xf0] }
 0x544   : > { %v1786_v35 = vor.u32 %v1955_v33, %v1785_v32 }
 0x546   : > { %1279 = vmatpush.bf16.msrb.mxu2 %v1786_v35 }
 0x5b6   : > { %v797_v37 = vpop.f32.mrf.mxu2 }
 0x5b7   : > { %966 = vrot.lane.b32.xlu0 %v797_v37, %s2043_s25  ;;  %v1793_v37 = vld [vmem:[%s2676_s9 + $0x88] sm:$0xf] }
 0x5b8   : > { %v961_v38 = vpop.f32.mrf.mxu1 }
 0x5b9   : > { %974 = vrot.lane.b32.xlu1 %v961_v38, %s2047_s12  ;;  %v1956_v38 = vld [vmem:[%s2676_s9 + $0x94] sm:$0xf0] }
 0x5ba   : > { %v1794_v41 = vor.u32 %v1956_v38, %v1793_v37  ;;  %v1061_v37 = vld [vmem:[%s2675_s8] sm:$0x1] }
 0x5bc   : > { %1305 = vmatpush.bf16.msrb.mxu1 %v1794_v41 }
 0x5be   : > { %v799_v42 = vpop.f32.mrf.mxu2 }
 0x5bf   : > { %v1954_v42 = vld [vmem:[%s2676_s9 + $0x8c] sm:$0xf] }
 0x5c0   : > { %v963_v43 = vpop.f32.mrf.mxu1 }
 0x5c1   : > { %v1795_v43 = vld [vmem:[%s2676_s9 + $0x98] sm:$0xf0] }
 0x5c6   : > { %v879_v44 = vpop.f32.mrf.mxu2 }
 0x5c7   : > { %970 = vrot.lane.b32.xlu2 %v879_v44, %s2045_s20  ;;  %v1798_v44 = vor.u32 %v1954_v42, %v1795_v43 }
 0x5c9   : > { %1318 = vmatpush.bf16.msra.mxu3 %v1798_v44 }
 0x5ce   : > { %v881_v45 = vpop.f32.mrf.mxu2 }
 0x5cf   : > { %v1769_v45 = vld [vmem:[%s2676_s9 + $0x60] sm:$0xf] }
 0x5d0   : > { %v1770_v47 = vor.u32 %v1951_v46, %v1769_v45 }
 0x5d2   : > { %1280 = vmatpush.bf16.msrb.mxu2 %v1770_v47  ;;  %v1976_v47 = vld [vmem:[%s2677_s10 + $0x38] sm:$0xff] }
 0x621   : > { %v971_v49 = vpop.permute.xlu2 %970 }
 0x629   : > { %v967_v48 = vpop.permute.xlu0 %966 }
 0x62a   : > { %v977_v50 = vsel %vm661_vm5, %v2359_v54, %v967_v48  ;;  %v1835_v54 = vld [vmem:[%s2676_s9 + $0xf0] sm:$0xf0] }
 0x62b   : > { %v975_v51 = vpop.permute.xlu1 %974  ;;  %v979_v52 = vsel %vm978_vm9, %v977_v50, %v971_v49  ;;  %v1838_v62 = vor.u32 %v1965_v57, %v1835_v54  ;;  %v1771_v48 = vld [vmem:[%s2676_s9 + $0x70] sm:$0xf0]  ;;  %v1777_v49 = vld [vmem:[%s2676_s9 + $0x68] sm:$0xf]  ;;  %v1952_v50 = vld [vmem:[%s2676_s9 + $0x74] sm:$0xf0] }
 0x62c   : > { %v981_v40 = vsel %vm980_vm10, %v979_v52, %v975_v51  ;;  %v1774_v51 = vor.u32 %v1949_v17, %v1771_v48  ;;  %v1778_v52 = vor.u32 %v1952_v50, %v1777_v49  ;;  %v1947_v57 = vld [vmem:[%s2676_s9 + $0x4c] sm:$0xf0]  ;;  %v1982_v48 = vld [vmem:[%s2677_s10 + $0x68] sm:$0xff]  ;;  %v1981_v50 = vld [vmem:[%s2677_s10 + $0x60] sm:$0xff] }
 0x62d   : > { %v982_v53 = vpack.c.bf16 %v981_v40, %v981_v40  ;;  %1289 = vmatpush.bf16.msrb.mxu0 %v1838_v62  ;;  %v1950_v40 = vld [vmem:[%s2676_s9 + $0x6c] sm:$0xf]  ;;  %v1754_v54 = vor.u32 %v1947_v57, %v1753_v56  ;;  %v1948_v62 = vld [vmem:[%s2676_s9 + $0x54] sm:$0xf0]  ;;  %v1983_v17 = vld [vmem:[%s2677_s10 + $0x70] sm:$0xff] }
 0x62e   : > { %1306 = vmatpush.bf16.msrb.mxu1 %v1778_v52  ;;  %v1762_v10 = vor.u32 %v1948_v62, %v1761_v61  ;;  %v1975_v49 = vld [vmem:[%s2677_s10 + $0x30] sm:$0xff]  ;;  %v1980_v52 = vld [vmem:[%s2677_s10 + $0x58] sm:$0xff]  ;;  %v1978_v56 = vld [vmem:[%s2677_s10 + $0x48] sm:$0xff] }
 0x62f   : > { %1055 = vmatmul.bf16.vlgmr.msrb.gmra.mxu3 %v982_v53  ;;  %v1779_v53 = vld [vmem:[%s2676_s9 + $0x78] sm:$0xf0]  ;;  %1281 = vmatpush.bf16.msrb.mxu2 %v1754_v54  ;;  %v1971_v57 = vld [vmem:[%s2677_s10 + $0x10] sm:$0xff]  ;;  %v1970_v54 = vld [vmem:[%s2677_s10 + $0x8] sm:$0xff] }
 0x630   : > { %v1782_v55 = vor.u32 %v1950_v40, %v1779_v53  ;;  %v1973_v40 = vld [vmem:[%s2677_s10 + $0x20] sm:$0xff]  ;;  %v1979_v53 = vld [vmem:[%s2677_s10 + $0x50] sm:$0xff] }
 0x632   : > { %1319 = vmatpush.bf16.msra.mxu3 %v1782_v55  ;;  %1307 = vmatpush.bf16.msrb.mxu1 %v1762_v10  ;;  %v1972_v55 = vld [vmem:[%s2677_s10 + $0x18] sm:$0xff] }
 0x6b2   : > { %v1056_v4 = vpop.f32.mrf.mxu3 }
 0x6b3   : > { %v2433_v5 = vadd.f32 %v1056_v4, %v2143_v7  ;;  %v1819_v7 = vld [vmem:[%s2676_s9 + $0xd0] sm:$0xf0]  ;;  %v1766_v4 = vor.u32 %v1946_v2, %v1763_v3 }
 0x6b4   : > { %v1822_v18 = vor.u32 %v1961_v13, %v1819_v7  ;;  %v1739_v13 = vld [vmem:[%s2676_s9 + $0x30] sm:$0xf0]  ;;  %v1944_v7 = vld [vmem:[%s2676_s9 + $0x34] sm:$0xf0] }
 0x6b5   : > { %v1062_v6 = vmul.f32 %v2433_v5, %v2433_v5  ;;  %1320 = vmatpush.bf16.msra.mxu3 %v1766_v4  ;;  %v1742_v15 = vor.u32 %v1941_v11, %v1739_v13  ;;  %v1746_v16 = vor.u32 %v1944_v7, %v1745_v14 }
 0x6b6   : > { %1290 = vmatpush.bf16.msrb.mxu0 %v1822_v18  ;;  %v1942_v18 = vld [vmem:[%s2676_s9 + $0x2c] sm:$0xf] }
 0x6b7   : > { %1063 = vadd.xlane.f32.xlu0 %v1062_v6  ;;  %v1737_v6 = vld [vmem:[%s2676_s9 + $0x20] sm:$0xf]  ;;  %v1750_v0 = vor.u32 %v1942_v18, %v1747_v19  ;;  %1308 = vmatpush.bf16.msrb.mxu1 %v1746_v16 }
 0x6b9   : > { %1321 = vmatpush.bf16.msra.mxu3 %v1750_v0 }
 0x6ba   : > { %v1058_v9 = vpop.f32.mrf.mxu3  ;;  %1291 = vmatpush.bf16.msrb.mxu0 %v1806_v27  ;;  %v1730_v27 = vor.u32 %v1940_v25, %v1729_v24 }
 0x6bb   : > { %v1943_v9 = vld [vmem:[%s2676_s9 + $0x2c] sm:$0xf0] }
 0x6bc   : > { %v1738_v12 = vor.u32 %v1943_v9, %v1737_v6  ;;  %1309 = vmatpush.bf16.msrb.mxu1 %v1730_v27 }
 0x6bd   : > { %1322 = vmatpush.bf16.msra.mxu3 %v1734_v29 }
 0x6be   : > { %1292 = vmatpush.bf16.msrb.mxu0 %v1790_v39  ;;  %1282 = vmatpush.bf16.msrb.mxu2 %v1738_v12  ;;  %v1078_v39 = vadd.f32 1.0, %v1061_v37 }
 0x6c0   : > { %v1080_v43 = vperm.slane %v1078_v39, 0 }
 0x6c2   : > { %1293 = vmatpush.bf16.msrb.mxu0 %v1774_v51  ;;  %1283 = vmatpush.bf16.msrb.mxu2 %v1722_v23  ;;  %v1974_v51 = vld [vmem:[%s2677_s10 + $0x28] sm:$0xff] }
 0x6c6   : > { %1294 = vmatpush.bf16.msrb.mxu0 %v1758_v1  ;;  %1478 = vmatpush.bf16.msra.mxu2 %v1976_v47 }
 0x6ca   : > { %1295 = vmatpush.bf16.msrb.mxu0 %v1742_v15  ;;  %1479 = vmatpush.bf16.msra.mxu2 %v1975_v49 }
 0x6ce   : > { %1296 = vmatpush.bf16.msrb.mxu0 %v1726_v8  ;;  %1480 = vmatpush.bf16.msra.mxu2 %v1974_v51 }
 0x6d2   : > { %1491 = vmatpush.bf16.msra.mxu0 %v1984_v30  ;;  %1481 = vmatpush.bf16.msra.mxu2 %v1973_v40 }
 0x6d6   : > { %1492 = vmatpush.bf16.msra.mxu0 %v1983_v17  ;;  %1482 = vmatpush.bf16.msra.mxu2 %v1972_v55 }
 0x6da   : > { %1493 = vmatpush.bf16.msra.mxu0 %v1982_v48  ;;  %1483 = vmatpush.bf16.msra.mxu2 %v1971_v57 }
 0x6de   : > { %1494 = vmatpush.bf16.msra.mxu0 %v1981_v50  ;;  %1484 = vmatpush.bf16.msra.mxu2 %v1970_v54 }
 0x6e2   : > { %1495 = vmatpush.bf16.msra.mxu0 %v1980_v52  ;;  %1485 = vmatpush.bf16.msra.mxu2 %v1969_v60 }
 0x6e6   : > { %1496 = vmatpush.bf16.msra.mxu0 %v1979_v53 }
 0x6ea   : > { %1497 = vmatpush.bf16.msra.mxu0 %v1978_v56 }
 0x6ee   : > { %1498 = vmatpush.bf16.msra.mxu0 %v1977_v58 }
 0x72a   : > { %v1064_v31 = vpop.xlane.xlu0 %1063 }
 0x72b   : > { %v1065_v32 = vmul.f32 %v1064_v31, %v2251_v59 }
 0x72d   : > { %v1066_v33 = vadd.f32 1e-06, %v1065_v32 }
 0x72f   : > { %2025 = vrsqrt.f32 %v1066_v33  ;;  %vm1073_vm12 = vweird.f32 %v1066_v33 }
 0x735   : > { %v2026_v34 = vpop.eup %2025 }
 0x736   : > { %v1068_v35 = vmul.f32 %v2026_v34, %v1066_v33  ;;  %vm1074_vm11 = vweird.f32 %v2026_v34 }
 0x737   : > { %vm1075_vm13 = vmor %vm1073_vm12, %vm1074_vm11 }
 0x738   : > { %v1069_v36 = vmul.f32 %v2026_v34, %v1068_v35 }
 0x73a   : > { %v1070_v38 = vmul.f32 0.5, %v1069_v36 }
 0x73c   : > { %v1071_v41 = vsub.f32 1.5, %v1070_v38 }
 0x73e   : > { %v1072_v42 = vmul.f32 %v2026_v34, %v1071_v41 }
 0x740   : > { %v1076_v44 = vsel %vm1075_vm13, %v2026_v34, %v1072_v42 }
 0x741   : > { %v1077_v59 = vmul.f32 %v1076_v44, %v2433_v5 }
 0x743   : > { %v1082_v45 = vmul.f32 %v1080_v43, %v1077_v59 }
 0x745   : > { %v1083_v46 = vpack.c.bf16 %v1082_v45, %v1082_v45 }
 0x747   : > { %1284 = vmatmul.bf16.vlgmr.msrb.gmra.mxu2 %v1083_v46  ;;  %1297 = vmatmul.bf16.vlgmr.msrb.gmra.mxu0 %v1083_v46 }
 0x748   : > { %1310 = vmatmul.bf16.vlgmr.msrb.gmra.mxu1 %v1083_v46  ;;  %1323 = vmatmul.bf16.vlgmr.msra.gmra.mxu3 %v1083_v46 }
 0x7c4   : > { %v1298_v61 = vpop.f32.mrf.mxu0 }
 0x7c5   : > { %v1329_v62 = vmul.f32 %v1298_v61, %v1298_v61  ;;  %v1311_v1 = vpop.f32.mrf.mxu1 }
 0x7c7   : > { %v1331_v10 = vmul.f32 %v1329_v62, %v1298_v61 }
 0x7c9   : > { %v1333_v2 = vmul.f32 0.044715, %v1331_v10 }
 0x7ca   : > { %v1285_v3 = vpop.f32.mrf.mxu2 }
 0x7cb   : > { %v1335_v4 = vadd.f32 %v1333_v2, %v1298_v61  ;;  %v1328_v6 = vmul.f32 %v1285_v3, %v1285_v3  ;;  %v1324_v9 = vpop.f32.mrf.mxu3 }
 0x7cc   : > { %v1300_v11 = vpop.f32.mrf.mxu0 }
 0x7cd   : > { %v1337_v12 = vmul.f32 0.7978846, %v1335_v4  ;;  %v1330_v13 = vmul.f32 %v1328_v6, %v1285_v3  ;;  %v1313_v14 = vpop.f32.mrf.mxu1 }
 0x7cf   : > { %v1332_v7 = vmul.f32 0.044715, %v1330_v13  ;;  %2027 = vtanh.f32 %v1337_v12 }
 0x7d1   : > { %v1334_v15 = vadd.f32 %v1332_v7, %v1285_v3 }
 0x7d2   : > { %v1287_v16 = vpop.f32.mrf.mxu2 }
 0x7d3   : > { %v1336_v18 = vmul.f32 0.7978846, %v1334_v15  ;;  %v1326_v19 = vpop.f32.mrf.mxu3 }
 0x7d5   : > { %v2028_v63 = vpop.eup %2027  ;;  %2029 = vtanh.f32 %v1336_v18 }
 0x7d6   : > { %v1341_v0 = vadd.f32 1.0, %v2028_v63 }
 0x7d8   : > { %v1343_v20 = vmul.f32 0.5, %v1341_v0 }
 0x7da   : > { %v1345_v21 = vmul.f32 %v1343_v20, %v1298_v61 }
 0x7db   : > { %v2030_v22 = vpop.eup %2029 }
 0x7dc   : > { %v1340_v23 = vadd.f32 1.0, %v2030_v22  ;;  %v1347_v8 = vmul.f32 %v1345_v21, %v1324_v9 }
 0x7de   : > { %v1342_v24 = vmul.f32 0.5, %v1340_v23  ;;  %v1349_v25 = vpack.c.bf16 %v1347_v8, %v1347_v8 }
 0x7e0   : > { %v1344_v26 = vmul.f32 %v1342_v24, %v1285_v3  ;;  %1499 = vmatmul.bf16.vlgmr.msra.gmra.mxu0 %v1349_v25 }
 0x7e2   : > { %v1346_v27 = vmul.f32 %v1344_v26, %v1311_v1 }
 0x7e4   : > { %v1348_v28 = vpack.c.bf16 %v1346_v27, %v1346_v27 }
 0x7e6   : > { %1486 = vmatmul.bf16.vlgmr.msra.gmra.mxu2 %v1348_v28 }
 0x85d   : > { %v1500_v29 = vpop.f32.mrf.mxu0 }
 0x865   : > { %v1502_v30 = vpop.f32.mrf.mxu0 }
 0x869   : > { %v1487_v31 = vpop.f32.mrf.mxu2 }
 0x86a   : > { %v1501_v32 = vadd.f32 %v1500_v29, %v1487_v31 }
 0x86c   : > { %v1504_v33 = vadd.f32 %v1501_v32, %v2433_v5 }
 0x86e   : > { %v1505_v34 = vpack.c.bf16 %v1504_v33, %v1504_v33 }
 0x870   : > { %1506 = vst [vmem:[%s446_s14] sm:$0xf] %v1505_v34 }
 0x871   : > { %v1489_v35 = vpop.f32.mrf.mxu2 }
 0x872 PF: > { %s21_s17 = sadd.s32 1, %s2037_s17  }
 0x873   : > { %p18_p4 = scmp.ge.s32.totalorder %s21_s17, 4  }
 0x875   :  { %20 = sbr.rel (!%p18_p4) target bundleno = 1 (0x1), region = 106 }

</bundles_post_ra>
